<compile_context>
chip_gen: v7x
topology: tpu7x:2x2x1
jax: 0.10.0
libtpu: 0.0.40
codegen_flags: <defaults>
</compile_context>

<pallas_src>
import math
from functools import partial

import jax
import jax.numpy as jnp
from jax import lax
from jax.experimental import pallas as pl
from jax.experimental.pallas import tpu as pltpu


# ----------------------------- tiling helpers ------------------------------ #

def _round_up(x, m):
    return (x + m - 1) // m * m


def _cdiv(a, b):
    return -(-a // b)


def _plan_tm(rows, kf, ef, *, tm_cap=512, min_steps=4, row_budget_bytes=24 << 20):
    """Row tile: multiple of 8, capped, derived from a VMEM budget.
    per-row bytes ~= double-buffered bf16 in/out tiles + ~5 f32 (tm, ef) temporaries."""
    per_row = 4 * kf + 24 * ef
    tm = min(tm_cap, max(8, row_budget_bytes // max(per_row, 1)))
    tm -= tm % 8
    tm = max(tm, 8)
    # Keep >= min_steps grid steps (2 per TensorCore on v7x) so the pipeline can overlap
    # input fetch / output writeback with compute.
    if _cdiv(rows, tm) < min_steps and rows > 8:
        tm = max(8, _round_up(_cdiv(rows, min_steps), 8))
    return min(tm, rows)


# ------------------------------ Pallas kernels ------------------------------ #

def _grouped_ln(y, sr, se, g, b, *, inv_c, eps):
    """Grouped-LayerNorm epilogue on a lane-dense (tm, E) f32 tile.

    Two-pass statistics over each contiguous group of c = E // p1 lanes (== LayerNorm(c)
    applied after the rearrange).  Group sums / broadcast-back use thin (E,P)/(P,E)
    bf16 indicator matmuls (exact 0/1 values), f32 MXU accumulation; rsqrt on the EUP.
    """
    gsum = jnp.dot(y.astype(jnp.bfloat16), sr,
                   preferred_element_type=jnp.float32)                    # (tm, P)
    mean = jnp.dot((gsum * inv_c).astype(jnp.bfloat16), se,
                   preferred_element_type=jnp.float32)                    # (tm, E)
    d = y - mean
    vsum = jnp.dot((d * d).astype(jnp.bfloat16), sr,
                   preferred_element_type=jnp.float32)                    # (tm, P)
    var = jnp.dot((vsum * inv_c).astype(jnp.bfloat16), se,
                  preferred_element_type=jnp.float32)                     # (tm, E)
    inv = lax.rsqrt(jnp.maximum(var, 0.0) + eps)
    return d * inv * g + b


def _expand_groupln_kernel(x_ref, w_ref, sr_ref, se_ref, g_ref, b_ref, o_ref, *, inv_c, eps):
    # bf16 x/w -> f32 accumulate on the MXU, fused grouped-LN epilogue, bf16 store.
    y = jnp.dot(x_ref[...], w_ref[...], preferred_element_type=jnp.float32)
    o_ref[...] = _grouped_ln(y, sr_ref[...], se_ref[...], g_ref[...], b_ref[...],
                             inv_c=inv_c, eps=eps).astype(o_ref.dtype)


def _groupln_kernel(x_ref, sr_ref, se_ref, g_ref, b_ref, o_ref, *, inv_c, eps):
    # Identity-expand path (dim_scale != 2): grouped LayerNorm only.
    y = x_ref[...].astype(jnp.float32)
    o_ref[...] = _grouped_ln(y, sr_ref[...], se_ref[...], g_ref[...], b_ref[...],
                             inv_c=inv_c, eps=eps).astype(o_ref.dtype)


# ------------------------------ kernel wrapper ------------------------------ #

def fused_expand_groupln(x2d, w, p1, gamma, beta, *, eps=1e-5):
    """x2d: (M, K) tokens (bf16).  y = x @ w (or y = x if w is None), then LayerNorm over
    each of the p1 contiguous channel groups of y.  Returns (M, E) bf16."""
    m, k = x2d.shape
    e = k if w is None else w.shape[1]
    c = e // p1                                  # LayerNorm(new_dim) width

    # Lane-dense row folding: when E < 128, pack `fold` consecutive tokens per kernel row
    # (pure row-major reshape) so the output tile is >= 128 lanes (unmasked stores);
    # the expand weight becomes block-diagonal via kron.
    fold = 1
    if e < 128 and 128 % e == 0:
        f = 128 // e
        if m % f == 0:
            fold = f
    kf, ef, pf = k * fold, e * fold, p1 * fold
    if fold > 1:
        x2d = x2d.reshape(m // fold, kf)
    rows = x2d.shape[0]

    P = _round_up(pf, 8)                          # pad group axis for friendly packing
    gidx = jnp.arange(ef) // c                    # group id per lane, 0..pf-1
    sr = (gidx[:, None] == jnp.arange(P)[None, :]).astype(jnp.bfloat16)   # (ef, P)
    se = sr.T                                                             # (P, ef)
    g_full = jnp.tile(gamma.astype(jnp.float32), pf).reshape(1, ef)
    b_full = jnp.tile(beta.astype(jnp.float32), pf).reshape(1, ef)

    rows_p = _round_up(rows, 8)                   # only the (8,128) sublane constraint
    if rows_p != rows:
        x2d = jnp.pad(x2d, ((0, rows_p - rows), (0, 0)))
    tm = _plan_tm(rows_p, kf, ef)
    grid = (_cdiv(rows_p, tm),)                   # ragged last block handled by Pallas

    cparams = pltpu.CompilerParams(
        dimension_semantics=("parallel",),
        vmem_limit_bytes=48 * 1024 * 1024)        # headroom under v7x 64 MiB physical

    common_specs = [
        pl.BlockSpec((ef, P), lambda i: (0, 0)),
        pl.BlockSpec((P, ef), lambda i: (0, 0)),
        pl.BlockSpec((1, ef), lambda i: (0, 0)),
        pl.BlockSpec((1, ef), lambda i: (0, 0)),
    ]
    out_spec = pl.BlockSpec((tm, ef), lambda i: (i, 0))
    out_shape = jax.ShapeDtypeStruct((rows_p, ef), jnp.bfloat16)

    if w is not None:
        wb = w if fold == 1 else jnp.kron(jnp.eye(fold, dtype=w.dtype), w)
        out = pl.pallas_call(
            partial(_expand_groupln_kernel, inv_c=1.0 / c, eps=eps),
            out_shape=out_shape,
            grid_spec=pltpu.PrefetchScalarGridSpec(
                num_scalar_prefetch=0,
                grid=grid,
                in_specs=[pl.BlockSpec((tm, kf), lambda i: (i, 0)),
                          pl.BlockSpec((kf, ef), lambda i: (0, 0))] + common_specs,
                out_specs=out_spec,
            ),
            compiler_params=cparams,
        )(x2d.astype(jnp.bfloat16), wb.astype(jnp.bfloat16), sr, se, g_full, b_full)
    else:
        out = pl.pallas_call(
            partial(_groupln_kernel, inv_c=1.0 / c, eps=eps),
            out_shape=out_shape,
            grid_spec=pltpu.PrefetchScalarGridSpec(
                num_scalar_prefetch=0,
                grid=grid,
                in_specs=[pl.BlockSpec((tm, ef), lambda i: (i, 0))] + common_specs,
                out_specs=out_spec,
            ),
            compiler_params=cparams,
        )(x2d.astype(jnp.bfloat16), sr, se, g_full, b_full)

    if rows_p != rows:
        out = out[:rows]
    if fold > 1:
        out = out.reshape(m, e)                   # free row-major unfold
    return out


# --------------------- module config / param construction ------------------ #

def build_stages(key, input_resolution, dim, dim_scale=2, preserve_dim=False):
    """Mirrors PatchExpanding_2D_3D.__init__ (synthetic deterministic params).
    Returns (down_scales: tuple[int], params: list[dict of arrays])."""
    H, W = input_resolution
    total_downsample = int(math.log(H, 2))
    expand_num = total_downsample // 2
    is_odd = total_downsample % 2
    expand_num += is_odd
    down_scales, params = [], []
    for idx in range(expand_num):
        if idx < expand_num - 1:
            down_scale, expand_dim, new_dim = 4, 4 * dim, dim
        else:
            if is_odd == 1:
                down_scale, expand_dim = 2, dim
            else:
                down_scale, expand_dim = 4, 2 * dim
            new_dim = dim // dim_scale
            if preserve_dim:
                expand_dim *= 2
                new_dim *= 2
        k = jax.random.fold_in(key, idx)
        if dim_scale == 2:
            # torch nn.Linear(dim, expand_dim, bias=False).weight is (expand_dim, dim);
            # stored pre-transposed as (dim, expand_dim) so y = x @ w.
            w = jax.random.normal(k, (dim, expand_dim), jnp.float32) / math.sqrt(dim)
        else:
            w = None  # nn.Identity()
        gamma = jnp.ones((new_dim,), jnp.float32)   # LayerNorm default init
        beta = jnp.zeros((new_dim,), jnp.float32)
        down_scales.append(down_scale)
        params.append(dict(w=w, gamma=gamma, beta=beta))
    return tuple(down_scales), params


# ------------------------------- forward pass ------------------------------ #

def _rearrange_z_expand(x, H, W, p1):
    """'b z h w (p1 c) -> b (z p1) h w c', then flatten back to (B, L', c)."""
    B, L, C = x.shape
    c = C // p1
    z = L // (H * W)
    x = x.reshape(B, z, H, W, p1, c)
    x = jnp.transpose(x, (0, 1, 4, 2, 3, 5))
    return x.reshape(B, z * p1 * H * W, c)


def patch_expanding_2d_3d(x, params, *, down_scales, input_resolution, return_vector=False):
    H, W = input_resolution
    Z = H
    B = x.shape[0]
    orig_dtype = x.dtype
    x = x.astype(jnp.bfloat16)          # bf16 activations end-to-end (single cast)
    last_C, last_down = x.shape[2], 1
    for st, p1 in zip(params, down_scales):
        Bc, L, C_in = x.shape
        # Fused Linear-expand + grouped LayerNorm (statistics taken pre-rearrange).
        y2d = fused_expand_groupln(x.reshape(Bc * L, C_in), st["w"], p1,
                                   st["gamma"], st["beta"])
        C = y2d.shape[1]
        y = y2d.reshape(Bc, L, C)
        # Pure data movement on already-normalized activations; left to XLA.
        # TODO(synk): folding this transpose into the kernel's out index_map would force
        # narrow c-lane stores, trading away the lane-dense out_spec win; keep it in XLA.
        x = _rearrange_z_expand(y, H, W, p1)
        last_C, last_down = C, p1
    if not return_vector:
        x = x.reshape(B, Z, H, W, last_C // last_down)
    return x.astype(orig_dtype)


def reference_forward(x, params, down_scales, input_resolution, return_vector=False):
    """Pure-JAX f32 reference matching the PyTorch forward semantics."""
    H, W = input_resolution
    Z = H
    B = x.shape[0]
    last_C, last_down = x.shape[2], 1
    for st, p1 in zip(params, down_scales):
        if st["w"] is not None:
            x = jnp.einsum("blc,cd->bld", x, st["w"],
                           precision=jax.lax.Precision.HIGHEST)
        B, L, C = x.shape
        x = _rearrange_z_expand(x, H, W, p1)
        mean = jnp.mean(x, axis=-1, keepdims=True)
        var = jnp.mean((x - mean) ** 2, axis=-1, keepdims=True)
        x = (x - mean) / jnp.sqrt(var + 1e-5) * st["gamma"] + st["beta"]
        last_C, last_down = C, p1
    if not return_vector:
        x = x.reshape(B, Z, H, W, last_C // last_down)
    return x


# ----------------------------------- main ----------------------------------- #

if __name__ == "__main__":
    key = jax.random.PRNGKey(0)
    B = 2
    H = W = 16          # input_resolution = (16, 16) -> 2 expand stages (4x, 4x)
    dim = 32
    input_resolution = (H, W)

    down_scales, params = build_stages(jax.random.fold_in(key, 1), input_resolution, dim)
    x = jax.random.normal(jax.random.fold_in(key, 2), (B, H * W, dim), jnp.float32)

    fwd = jax.jit(patch_expanding_2d_3d,
                  static_argnames=("down_scales", "input_resolution", "return_vector"))
    out = fwd(x, params, down_scales=down_scales, input_resolution=input_resolution)
    out = jax.block_until_ready(out)

    # Expected output: (B, Z=H, H, W, dim // dim_scale)
    assert out.shape == (B, H, H, W, dim // 2), out.shape

    ref = reference_forward(x, params, down_scales, input_resolution)
    assert jnp.allclose(out, ref, atol=5e-2, rtol=5e-2), \
        float(jnp.max(jnp.abs(out - ref)))

    print("KERNEL_OK")
</pallas_src>

<mosaic_0001>
module attributes {stable_mosaic.version = 11 : i64} {
  func.func @_expand_groupln_kernel(%arg0: i32, %arg1: memref<128x32xbf16, #tpu.memory_space<vmem>>, %arg2: memref<32x128xbf16, #tpu.memory_space<vmem>>, %arg3: memref<128x8xbf16, #tpu.memory_space<vmem>>, %arg4: memref<8x128xbf16, #tpu.memory_space<vmem>>, %arg5: memref<1x128xf32, #tpu.memory_space<vmem>>, %arg6: memref<1x128xf32, #tpu.memory_space<vmem>>, %arg7: memref<128x128xbf16, #tpu.memory_space<vmem>>) attributes {dimension_semantics = [#tpu.dimension_semantics<parallel>], iteration_bounds = array<i64: 4>, scalar_prefetch = 0 : i64, scratch_operands = 0 : i64, tpu.core_type = #tpu.core_type<tc>, window_params = [{transform_indices = @transform_0, window_bounds = array<i64: 128, 32>}, {pipeline_mode = #tpu.pipeline_mode<synchronous>, transform_indices = @transform_1, window_bounds = array<i64: 32, 128>}, {pipeline_mode = #tpu.pipeline_mode<synchronous>, transform_indices = @transform_2, window_bounds = array<i64: 128, 8>}, {pipeline_mode = #tpu.pipeline_mode<synchronous>, transform_indices = @transform_3, window_bounds = array<i64: 8, 128>}, {pipeline_mode = #tpu.pipeline_mode<synchronous>, transform_indices = @transform_4, window_bounds = array<i64: 1, 128>}, {pipeline_mode = #tpu.pipeline_mode<synchronous>, transform_indices = @transform_5, window_bounds = array<i64: 1, 128>}, {transform_indices = @transform_6, window_bounds = array<i64: 128, 128>}]} {
    %c0 = arith.constant 0 : index
    %c0_0 = arith.constant 0 : index
    %0 = vector.load %arg1[%c0, %c0_0] : memref<128x32xbf16, #tpu.memory_space<vmem>>, vector<128x32xbf16>
    %c0_1 = arith.constant 0 : index
    %c0_2 = arith.constant 0 : index
    %1 = vector.load %arg2[%c0_1, %c0_2] : memref<32x128xbf16, #tpu.memory_space<vmem>>, vector<32x128xbf16>
    %cst = arith.constant dense<0.000000e+00> : vector<128x128xf32>
    %2 = tpu.matmul %0, %1, %cst {dimension_numbers = #tpu.dot_dimension_numbers<[1], [0], [0], [1], [0, 0, 1, 1], [], []>} : vector<128x32xbf16>, vector<32x128xbf16>, vector<128x128xf32> -> vector<128x128xf32>
    %c0_3 = arith.constant 0 : index
    %c0_4 = arith.constant 0 : index
    %3 = vector.load %arg3[%c0_3, %c0_4] : memref<128x8xbf16, #tpu.memory_space<vmem>>, vector<128x8xbf16>
    %c0_5 = arith.constant 0 : index
    %c0_6 = arith.constant 0 : index
    %4 = vector.load %arg4[%c0_5, %c0_6] : memref<8x128xbf16, #tpu.memory_space<vmem>>, vector<8x128xbf16>
    %c0_7 = arith.constant 0 : index
    %c0_8 = arith.constant 0 : index
    %5 = vector.load %arg5[%c0_7, %c0_8] : memref<1x128xf32, #tpu.memory_space<vmem>>, vector<1x128xf32>
    %c0_9 = arith.constant 0 : index
    %c0_10 = arith.constant 0 : index
    %6 = vector.load %arg6[%c0_9, %c0_10] : memref<1x128xf32, #tpu.memory_space<vmem>>, vector<1x128xf32>
    %7 = arith.truncf %2 : vector<128x128xf32> to vector<128x128xbf16>
    %cst_11 = arith.constant dense<0.000000e+00> : vector<128x8xf32>
    %8 = tpu.matmul %7, %3, %cst_11 {dimension_numbers = #tpu.dot_dimension_numbers<[1], [0], [0], [1], [0, 0, 1, 1], [], []>} : vector<128x128xbf16>, vector<128x8xbf16>, vector<128x8xf32> -> vector<128x8xf32>
    %cst_12 = arith.constant 3.125000e-02 : f32
    %9 = vector.broadcast %cst_12 : f32 to vector<128x8xf32>
    %10 = arith.mulf %8, %9 : vector<128x8xf32>
    %11 = arith.truncf %10 : vector<128x8xf32> to vector<128x8xbf16>
    %cst_13 = arith.constant dense<0.000000e+00> : vector<128x128xf32>
    %12 = tpu.matmul %11, %4, %cst_13 {dimension_numbers = #tpu.dot_dimension_numbers<[1], [0], [0], [1], [0, 0, 1, 1], [], []>} : vector<128x8xbf16>, vector<8x128xbf16>, vector<128x128xf32> -> vector<128x128xf32>
    %13 = arith.subf %2, %12 : vector<128x128xf32>
    %14 = arith.mulf %13, %13 : vector<128x128xf32>
    %15 = arith.truncf %14 : vector<128x128xf32> to vector<128x128xbf16>
    %cst_14 = arith.constant dense<0.000000e+00> : vector<128x8xf32>
    %16 = tpu.matmul %15, %3, %cst_14 {dimension_numbers = #tpu.dot_dimension_numbers<[1], [0], [0], [1], [0, 0, 1, 1], [], []>} : vector<128x128xbf16>, vector<128x8xbf16>, vector<128x8xf32> -> vector<128x8xf32>
    %cst_15 = arith.constant 3.125000e-02 : f32
    %17 = vector.broadcast %cst_15 : f32 to vector<128x8xf32>
    %18 = arith.mulf %16, %17 : vector<128x8xf32>
    %19 = arith.truncf %18 : vector<128x8xf32> to vector<128x8xbf16>
    %cst_16 = arith.constant dense<0.000000e+00> : vector<128x128xf32>
    %20 = tpu.matmul %19, %4, %cst_16 {dimension_numbers = #tpu.dot_dimension_numbers<[1], [0], [0], [1], [0, 0, 1, 1], [], []>} : vector<128x8xbf16>, vector<8x128xbf16>, vector<128x128xf32> -> vector<128x128xf32>
    %cst_17 = arith.constant 0.000000e+00 : f32
    %21 = vector.broadcast %cst_17 : f32 to vector<128x128xf32>
    %22 = arith.maximumf %20, %21 : vector<128x128xf32>
    %cst_18 = arith.constant 9.99999974E-6 : f32
    %23 = vector.broadcast %cst_18 : f32 to vector<128x128xf32>
    %24 = arith.addf %22, %23 : vector<128x128xf32>
    %25 = math.rsqrt %24 : vector<128x128xf32>
    %26 = arith.mulf %13, %25 : vector<128x128xf32>
    %27 = vector.broadcast %5 : vector<1x128xf32> to vector<128x128xf32>
    %28 = arith.mulf %26, %27 : vector<128x128xf32>
    %29 = vector.broadcast %6 : vector<1x128xf32> to vector<128x128xf32>
    %30 = arith.addf %28, %29 : vector<128x128xf32>
    %31 = arith.truncf %30 : vector<128x128xf32> to vector<128x128xbf16>
    %c0_19 = arith.constant 0 : index
    %c0_20 = arith.constant 0 : index
    %32 = vector.load %arg7[%c0_19, %c0_20] : memref<128x128xbf16, #tpu.memory_space<vmem>>, vector<128x128xbf16>
    tpu.vector_store %arg7[%c0_19, %c0_20], %31 {strides = array<i32>} : memref<128x128xbf16, #tpu.memory_space<vmem>>, vector<128x128xbf16>,
    return
  }
  func.func @transform_0(%arg0: i32) -> (i32, i32) {
    %c0_i32 = arith.constant 0 : i32
    %c0_i32_0 = arith.constant 0 : i32
    return %arg0, %c0_i32 : i32, i32
  }
  func.func @transform_1(%arg0: i32) -> (i32, i32) {
    %c0_i32 = arith.constant 0 : i32
    %c0_i32_0 = arith.constant 0 : i32
    %c0_i32_1 = arith.constant 0 : i32
    return %c0_i32, %c0_i32_0 : i32, i32
  }
  func.func @transform_2(%arg0: i32) -> (i32, i32) {
    %c0_i32 = arith.constant 0 : i32
    %c0_i32_0 = arith.constant 0 : i32
    %c0_i32_1 = arith.constant 0 : i32
    return %c0_i32, %c0_i32_0 : i32, i32
  }
  func.func @transform_3(%arg0: i32) -> (i32, i32) {
    %c0_i32 = arith.constant 0 : i32
    %c0_i32_0 = arith.constant 0 : i32
    %c0_i32_1 = arith.constant 0 : i32
    return %c0_i32, %c0_i32_0 : i32, i32
  }
  func.func @transform_4(%arg0: i32) -> (i32, i32) {
    %c0_i32 = arith.constant 0 : i32
    %c0_i32_0 = arith.constant 0 : i32
    %c0_i32_1 = arith.constant 0 : i32
    return %c0_i32, %c0_i32_0 : i32, i32
  }
  func.func @transform_5(%arg0: i32) -> (i32, i32) {
    %c0_i32 = arith.constant 0 : i32
    %c0_i32_0 = arith.constant 0 : i32
    %c0_i32_1 = arith.constant 0 : i32
    return %c0_i32, %c0_i32_0 : i32, i32
  }
  func.func @transform_6(%arg0: i32) -> (i32, i32) {
    %c0_i32 = arith.constant 0 : i32
    %c0_i32_0 = arith.constant 0 : i32
    return %arg0, %c0_i32 : i32, i32
  }
}

module attributes {stable_mosaic.version = 11 : i64} {
  func.func @_expand_groupln_kernel(%arg0: i32, %arg1: memref<256x64xbf16, #tpu.memory_space<vmem>>, %arg2: memref<64x128xbf16, #tpu.memory_space<vmem>>, %arg3: memref<128x8xbf16, #tpu.memory_space<vmem>>, %arg4: memref<8x128xbf16, #tpu.memory_space<vmem>>, %arg5: memref<1x128xf32, #tpu.memory_space<vmem>>, %arg6: memref<1x128xf32, #tpu.memory_space<vmem>>, %arg7: memref<256x128xbf16, #tpu.memory_space<vmem>>) attributes {dimension_semantics = [#tpu.dimension_semantics<parallel>], iteration_bounds = array<i64: 4>, scalar_prefetch = 0 : i64, scratch_operands = 0 : i64, tpu.core_type = #tpu.core_type<tc>, window_params = [{transform_indices = @transform_0, window_bounds = array<i64: 256, 64>}, {pipeline_mode = #tpu.pipeline_mode<synchronous>, transform_indices = @transform_1, window_bounds = array<i64: 64, 128>}, {pipeline_mode = #tpu.pipeline_mode<synchronous>, transform_indices = @transform_2, window_bounds = array<i64: 128, 8>}, {pipeline_mode = #tpu.pipeline_mode<synchronous>, transform_indices = @transform_3, window_bounds = array<i64: 8, 128>}, {pipeline_mode = #tpu.pipeline_mode<synchronous>, transform_indices = @transform_4, window_bounds = array<i64: 1, 128>}, {pipeline_mode = #tpu.pipeline_mode<synchronous>, transform_indices = @transform_5, window_bounds = array<i64: 1, 128>}, {transform_indices = @transform_6, window_bounds = array<i64: 256, 128>}]} {
    %c0 = arith.constant 0 : index
    %c0_0 = arith.constant 0 : index
    %0 = vector.load %arg1[%c0, %c0_0] : memref<256x64xbf16, #tpu.memory_space<vmem>>, vector<256x64xbf16>
    %c0_1 = arith.constant 0 : index
    %c0_2 = arith.constant 0 : index
    %1 = vector.load %arg2[%c0_1, %c0_2] : memref<64x128xbf16, #tpu.memory_space<vmem>>, vector<64x128xbf16>
    %cst = arith.constant dense<0.000000e+00> : vector<256x128xf32>
    %2 = tpu.matmul %0, %1, %cst {dimension_numbers = #tpu.dot_dimension_numbers<[1], [0], [0], [1], [0, 0, 1, 1], [], []>} : vector<256x64xbf16>, vector<64x128xbf16>, vector<256x128xf32> -> vector<256x128xf32>
    %c0_3 = arith.constant 0 : index
    %c0_4 = arith.constant 0 : index
    %3 = vector.load %arg3[%c0_3, %c0_4] : memref<128x8xbf16, #tpu.memory_space<vmem>>, vector<128x8xbf16>
    %c0_5 = arith.constant 0 : index
    %c0_6 = arith.constant 0 : index
    %4 = vector.load %arg4[%c0_5, %c0_6] : memref<8x128xbf16, #tpu.memory_space<vmem>>, vector<8x128xbf16>
    %c0_7 = arith.constant 0 : index
    %c0_8 = arith.constant 0 : index
    %5 = vector.load %arg5[%c0_7, %c0_8] : memref<1x128xf32, #tpu.memory_space<vmem>>, vector<1x128xf32>
    %c0_9 = arith.constant 0 : index
    %c0_10 = arith.constant 0 : index
    %6 = vector.load %arg6[%c0_9, %c0_10] : memref<1x128xf32, #tpu.memory_space<vmem>>, vector<1x128xf32>
    %7 = arith.truncf %2 : vector<256x128xf32> to vector<256x128xbf16>
    %cst_11 = arith.constant dense<0.000000e+00> : vector<256x8xf32>
    %8 = tpu.matmul %7, %3, %cst_11 {dimension_numbers = #tpu.dot_dimension_numbers<[1], [0], [0], [1], [0, 0, 1, 1], [], []>} : vector<256x128xbf16>, vector<128x8xbf16>, vector<256x8xf32> -> vector<256x8xf32>
    %cst_12 = arith.constant 6.250000e-02 : f32
    %9 = vector.broadcast %cst_12 : f32 to vector<256x8xf32>
    %10 = arith.mulf %8, %9 : vector<256x8xf32>
    %11 = arith.truncf %10 : vector<256x8xf32> to vector<256x8xbf16>
    %cst_13 = arith.constant dense<0.000000e+00> : vector<256x128xf32>
    %12 = tpu.matmul %11, %4, %cst_13 {dimension_numbers = #tpu.dot_dimension_numbers<[1], [0], [0], [1], [0, 0, 1, 1], [], []>} : vector<256x8xbf16>, vector<8x128xbf16>, vector<256x128xf32> -> vector<256x128xf32>
    %13 = arith.subf %2, %12 : vector<256x128xf32>
    %14 = arith.mulf %13, %13 : vector<256x128xf32>
    %15 = arith.truncf %14 : vector<256x128xf32> to vector<256x128xbf16>
    %cst_14 = arith.constant dense<0.000000e+00> : vector<256x8xf32>
    %16 = tpu.matmul %15, %3, %cst_14 {dimension_numbers = #tpu.dot_dimension_numbers<[1], [0], [0], [1], [0, 0, 1, 1], [], []>} : vector<256x128xbf16>, vector<128x8xbf16>, vector<256x8xf32> -> vector<256x8xf32>
    %cst_15 = arith.constant 6.250000e-02 : f32
    %17 = vector.broadcast %cst_15 : f32 to vector<256x8xf32>
    %18 = arith.mulf %16, %17 : vector<256x8xf32>
    %19 = arith.truncf %18 : vector<256x8xf32> to vector<256x8xbf16>
    %cst_16 = arith.constant dense<0.000000e+00> : vector<256x128xf32>
    %20 = tpu.matmul %19, %4, %cst_16 {dimension_numbers = #tpu.dot_dimension_numbers<[1], [0], [0], [1], [0, 0, 1, 1], [], []>} : vector<256x8xbf16>, vector<8x128xbf16>, vector<256x128xf32> -> vector<256x128xf32>
    %cst_17 = arith.constant 0.000000e+00 : f32
    %21 = vector.broadcast %cst_17 : f32 to vector<256x128xf32>
    %22 = arith.maximumf %20, %21 : vector<256x128xf32>
    %cst_18 = arith.constant 9.99999974E-6 : f32
    %23 = vector.broadcast %cst_18 : f32 to vector<256x128xf32>
    %24 = arith.addf %22, %23 : vector<256x128xf32>
    %25 = math.rsqrt %24 : vector<256x128xf32>
    %26 = arith.mulf %13, %25 : vector<256x128xf32>
    %27 = vector.broadcast %5 : vector<1x128xf32> to vector<256x128xf32>
    %28 = arith.mulf %26, %27 : vector<256x128xf32>
    %29 = vector.broadcast %6 : vector<1x128xf32> to vector<256x128xf32>
    %30 = arith.addf %28, %29 : vector<256x128xf32>
    %31 = arith.truncf %30 : vector<256x128xf32> to vector<256x128xbf16>
    %c0_19 = arith.constant 0 : index
    %c0_20 = arith.constant 0 : index
    %32 = vector.load %arg7[%c0_19, %c0_20] : memref<256x128xbf16, #tpu.memory_space<vmem>>, vector<256x128xbf16>
    tpu.vector_store %arg7[%c0_19, %c0_20], %31 {strides = array<i32>} : memref<256x128xbf16, #tpu.memory_space<vmem>>, vector<256x128xbf16>,
    return
  }
  func.func @transform_0(%arg0: i32) -> (i32, i32) {
    %c0_i32 = arith.constant 0 : i32
    %c0_i32_0 = arith.constant 0 : i32
    return %arg0, %c0_i32 : i32, i32
  }
  func.func @transform_1(%arg0: i32) -> (i32, i32) {
    %c0_i32 = arith.constant 0 : i32
    %c0_i32_0 = arith.constant 0 : i32
    %c0_i32_1 = arith.constant 0 : i32
    return %c0_i32, %c0_i32_0 : i32, i32
  }
  func.func @transform_2(%arg0: i32) -> (i32, i32) {
    %c0_i32 = arith.constant 0 : i32
    %c0_i32_0 = arith.constant 0 : i32
    %c0_i32_1 = arith.constant 0 : i32
    return %c0_i32, %c0_i32_0 : i32, i32
  }
  func.func @transform_3(%arg0: i32) -> (i32, i32) {
    %c0_i32 = arith.constant 0 : i32
    %c0_i32_0 = arith.constant 0 : i32
    %c0_i32_1 = arith.constant 0 : i32
    return %c0_i32, %c0_i32_0 : i32, i32
  }
  func.func @transform_4(%arg0: i32) -> (i32, i32) {
    %c0_i32 = arith.constant 0 : i32
    %c0_i32_0 = arith.constant 0 : i32
    %c0_i32_1 = arith.constant 0 : i32
    return %c0_i32, %c0_i32_0 : i32, i32
  }
  func.func @transform_5(%arg0: i32) -> (i32, i32) {
    %c0_i32 = arith.constant 0 : i32
    %c0_i32_0 = arith.constant 0 : i32
    %c0_i32_1 = arith.constant 0 : i32
    return %c0_i32, %c0_i32_0 : i32, i32
  }
  func.func @transform_6(%arg0: i32) -> (i32, i32) {
    %c0_i32 = arith.constant 0 : i32
    %c0_i32_0 = arith.constant 0 : i32
    return %arg0, %c0_i32 : i32, i32
  }
}

</mosaic_0001>

<bundles_post_ra>
// kernel: tile.38
= control target key start
LH: loop header
LB: loop body
LE: loop exit
PB: predicated region body
PF: predicated region fallthrough
CT: control target
= control target key end

     0   :  { %2 = vsyncpa [#allocation1], 0  ;;  %s44_s6 = smov [#allocation0]   ;;  %s70_s0 = inlined_call_operand.hbm [shape: f32[16], index: 0, kind: input, shape index: {}]   ;;  %s71_s1 = inlined_call_operand.vmem [shape: f32[8,16], index: 1, kind: output, shape index: {}]  }
   0x1   :  { %s9_s7 = sshll.u32 %s44_s6, 4  ;;  %s20_s10 = scalar_lea.hbm %s70_s0, 16  ;;  %s10_s7 = int_to_ptr.vmem [resolvable:$true] %s9_s7 }
   0x2   :  { %p21_p0 = scmp.ne.s32.totalorder %s70_s0, %s20_s10  ;;  %p24_p1 = scmp.lt.u32.totalorder %s20_s10, %s70_s0 }
   0x4   :  { %p26_p2 = pnand %p24_p1, %p21_p0 }
   0x6   :  { %29 = shalt.err (!%p26_p2)
}
   0x7   :  { %s30_s15 = scalar_lea.vmem %s10_s7, 16  ;;  %s34_s16 = scalar_lea.vmem %s10_s7, 32 }
   0x8   :  { %p31_p3 = scmp.ne.s32.totalorder %s10_s7, %s30_s15  ;;  %p35_p4 = scmp.lt.s32.totalorder %s10_s7, %s10_s7 }
   0x9   :  { %p36_p5 = scmp.lt.s32.totalorder %s34_s16, %s30_s15 }
   0xb   :  { %p37_p6 = por %p36_p5, %p35_p4 }
   0xd   :  { %p38_p7 = pnand %p37_p6, %p31_p3 }
   0xf   :  { %41 = shalt.err (!%p38_p7)
}
  0x10   :  { %12 = dma.hbm_to_vmem [thread:$0]  %s70_s0, 16, %s10_s7, [#allocation1]  }
  0x11   :  { %42 = dma.done.wait [#allocation1], 16  }
  0x12   :  { %43 = vsyncadd [#allocation1], 4294967280  ;;  %v16_v0 = vld [vmem:[#allocation0] ss:$0 sm:$0xff] }
  0x13   :  { %17 = vst [vmem:[%s71_s1] sm:$0xff] %v16_v0 }
  0x14   :  { %18 = vsyncpa [#allocation1], 1 }

// kernel: tile.28
= control target key start
LH: loop header
LB: loop body
LE: loop exit
PB: predicated region body
PF: predicated region fallthrough
CT: control target
= control target key end

     0   :  { %2 = vsyncpa [#allocation1], 0  ;;  %s44_s6 = smov [#allocation0]   ;;  %s70_s0 = inlined_call_operand.hbm [shape: f32[32], index: 0, kind: input, shape index: {}]   ;;  %s71_s1 = inlined_call_operand.vmem [shape: f32[4,32], index: 1, kind: output, shape index: {}]  }
   0x1   :  { %s9_s7 = sshll.u32 %s44_s6, 4  ;;  %s20_s10 = scalar_lea.hbm %s70_s0, 16  ;;  %s10_s7 = int_to_ptr.vmem [resolvable:$true] %s9_s7 }
   0x2   :  { %p21_p0 = scmp.ne.s32.totalorder %s70_s0, %s20_s10  ;;  %p24_p1 = scmp.lt.u32.totalorder %s20_s10, %s70_s0 }
   0x4   :  { %p26_p2 = pnand %p24_p1, %p21_p0 }
   0x6   :  { %29 = shalt.err (!%p26_p2)
}
   0x7   :  { %s30_s15 = scalar_lea.vmem %s10_s7, 16  ;;  %s34_s16 = scalar_lea.vmem %s10_s7, 32 }
   0x8   :  { %p31_p3 = scmp.ne.s32.totalorder %s10_s7, %s30_s15  ;;  %p35_p4 = scmp.lt.s32.totalorder %s10_s7, %s10_s7 }
   0x9   :  { %p36_p5 = scmp.lt.s32.totalorder %s34_s16, %s30_s15 }
   0xb   :  { %p37_p6 = por %p36_p5, %p35_p4 }
   0xd   :  { %p38_p7 = pnand %p37_p6, %p31_p3 }
   0xf   :  { %41 = shalt.err (!%p38_p7)
}
  0x10   :  { %12 = dma.hbm_to_vmem [thread:$0]  %s70_s0, 16, %s10_s7, [#allocation1]  }
  0x11   :  { %42 = dma.done.wait [#allocation1], 16  }
  0x12   :  { %43 = vsyncadd [#allocation1], 4294967280  ;;  %v16_v0 = vld [vmem:[#allocation0] ss:$0 sm:$0xff] }
  0x13   :  { %17 = vst [vmem:[%s71_s1] sm:$0xf] %v16_v0 }
  0x14   :  { %18 = vsyncpa [#allocation1], 1 }

// kernel: tile.29
= control target key start
LH: loop header
LB: loop body
LE: loop exit
PB: predicated region body
PF: predicated region fallthrough
CT: control target
= control target key end

     0   :  { %vm7_vm0 = vcmask 261120   ;;  %s37_s8 = smov 32   ;;  %s38_s9 = smov 64   ;;  %vm13_vm1 = vcmask 1048320   ;;  %vm19_vm2 = vcmask 785920   ;;  %vm25_vm3 = vcmask 523520   ;;  %s55_s0 = inlined_call_operand.vmem [shape: f32[4,32], index: 0, kind: input, shape index: {}]   ;;  %s56_s1 = inlined_call_operand.vmem [shape: f32[1,128], index: 1, kind: output, shape index: {}]  }
   0x1   :  { %v4_v0 = vld [vmem:[%s55_s0] sm:$0xf]  ;;  %s36_s0 = smov 96  }
   0x2   :  { %5 = vst [vmem:[#allocation1] sm:$0xf] %v4_v0 }
   0x9   :  { %v10_v1 = vld [vmem:[#allocation1 + $0x3] sm:$0x1]   ;;  %v22_v2 = vld [vmem:[#allocation1 + $0x1] sm:$0x1]   ;;  %v6_v3 = vld [vmem:[#allocation1] sm:$0x1]  }
   0xa   :  { %11 = vrot.lane.b32.xlu0 %v10_v1, %s36_s0  ;;  %23 = vrot.lane.b32.xlu1 %v22_v2, %s37_s8  ;;  %v16_v4 = vld [vmem:[#allocation1 + $0x2] sm:$0x1]   ;;  %8 = vst.msk [vmem:[#allocation0] sm:$0x1] %vm7_vm0, %v6_v3  }
   0xe   :  { %17 = vrot.lane.b32.xlu0 %v16_v4, %s38_s9 }
  0x7c   :  { %v12_v5 = vpop.permute.xlu0 %11   ;;  %v24_v6 = vpop.permute.xlu1 %23  }
  0x7d   :  { %14 = vst.msk [vmem:[#allocation0] sm:$0x1] %vm13_vm1, %v12_v5  }
  0x80   :  { %v18_v7 = vpop.permute.xlu0 %17  }
  0x81   :  { %20 = vst.msk [vmem:[#allocation0] sm:$0x1] %vm19_vm2, %v18_v7  }
  0x82   :  { %26 = vst.msk [vmem:[#allocation0] sm:$0x1] %vm25_vm3, %v24_v6  }
  0x89   :  { %v30_v8 = vld [vmem:[#allocation0] sm:$0x1] }
  0x8a   :  { %32 = vst [vmem:[%s56_s1] sm:$0x1] %v30_v8 }

// kernel: tile.39
= control target key start
LH: loop header
LB: loop body
LE: loop exit
PB: predicated region body
PF: predicated region fallthrough
CT: control target
= control target key end

     0   :  { %s67_s10 = smov 112   ;;  %s68_s11 = smov 80   ;;  %vm3_vm0 = vcmask 130048   ;;  %vm9_vm1 = vcmask 1048448   ;;  %vm15_vm2 = vcmask 917248   ;;  %vm21_vm3 = vcmask 786048   ;;  %s111_s0 = inlined_call_operand.vmem [shape: f32[8,16], index: 0, kind: input, shape index: {}]   ;;  %s112_s1 = inlined_call_operand.vmem [shape: f32[1,128], index: 1, kind: output, shape index: {}]  }
   0x1   :  { %v53_v0 = vld [vmem:[%s111_s0 + $0x7] sm:$0x1]   ;;  %v55_v1 = vld [vmem:[%s111_s0 + $0x5] sm:$0x1]   ;;  %v54_v2 = vld [vmem:[%s111_s0 + $0x6] sm:$0x1]  }
   0x2   :  { %7 = vrot.lane.b32.xlu0 %v53_v0, %s67_s10  ;;  %19 = vrot.lane.b32.xlu1 %v55_v1, %s68_s11  ;;  %v56_v3 = vld [vmem:[%s111_s0 + $0x4] sm:$0x1]   ;;  %v2_v4 = vld [vmem:[%s111_s0] sm:$0x1]   ;;  %s69_s18 = smov 96   ;;  %s70_s19 = smov 64  }
   0x3   :  { %4 = vst.msk [vmem:[#allocation0] sm:$0x1] %vm3_vm0, %v2_v4   ;;  %v57_v5 = vld [vmem:[%s111_s0 + $0x3] sm:$0x1]   ;;  %v58_v6 = vld [vmem:[%s111_s0 + $0x2] sm:$0x1]  }
   0x4   :  { %s71_s24 = smov 48   ;;  %s72_s25 = smov 32   ;;  %v59_v7 = vld [vmem:[%s111_s0 + $0x1] sm:$0x1]   ;;  %vm27_vm4 = vcmask 654848   ;;  %vm33_vm5 = vcmask 523648  }
   0x5   :  { %s73_s0 = smov 16   ;;  %vm39_vm6 = vcmask 392448   ;;  %vm45_vm7 = vcmask 261248  }
   0x6   :  { %13 = vrot.lane.b32.xlu0 %v54_v2, %s69_s18  ;;  %25 = vrot.lane.b32.xlu1 %v56_v3, %s70_s19 }
   0xa   :  { %31 = vrot.lane.b32.xlu0 %v57_v5, %s71_s24  ;;  %37 = vrot.lane.b32.xlu1 %v58_v6, %s72_s25 }
   0xe   :  { %43 = vrot.lane.b32.xlu0 %v59_v7, %s73_s0 }
  0x74   :  { %v8_v8 = vpop.permute.xlu0 %7   ;;  %v20_v9 = vpop.permute.xlu1 %19  }
  0x75   :  { %10 = vst.msk [vmem:[#allocation0] sm:$0x1] %vm9_vm1, %v8_v8  }
  0x78   :  { %v14_v10 = vpop.permute.xlu0 %13   ;;  %v26_v11 = vpop.permute.xlu1 %25  }
  0x79   :  { %16 = vst.msk [vmem:[#allocation0] sm:$0x1] %vm15_vm2, %v14_v10  }
  0x7a   :  { %22 = vst.msk [vmem:[#allocation0] sm:$0x1] %vm21_vm3, %v20_v9  }
  0x7b   :  { %28 = vst.msk [vmem:[#allocation0] sm:$0x1] %vm27_vm4, %v26_v11  }
  0x7c   :  { %v32_v12 = vpop.permute.xlu0 %31   ;;  %v38_v13 = vpop.permute.xlu1 %37  }
  0x7d   :  { %34 = vst.msk [vmem:[#allocation0] sm:$0x1] %vm33_vm5, %v32_v12  }
  0x7e   :  { %40 = vst.msk [vmem:[#allocation0] sm:$0x1] %vm39_vm6, %v38_v13  }
  0x80   :  { %v44_v14 = vpop.permute.xlu0 %43  }
  0x81   :  { %46 = vst.msk [vmem:[#allocation0] sm:$0x1] %vm45_vm7, %v44_v14  }
  0x88   :  { %v50_v15 = vld [vmem:[#allocation0] sm:$0x1] }
  0x89   :  { %52 = vst [vmem:[%s112_s1] sm:$0x1] %v50_v15 }

// kernel: patch_expanding_2d_3d.2
= control target key start
LH: loop header
LB: loop body
LE: loop exit
PB: predicated region body
PF: predicated region fallthrough
CT: control target
= control target key end

     0   :  { %s1715_s21 = smov 0   ;;  %s2030_s0 = inlined_call_operand.vmem [shape: bf16[512,32], index: 0, kind: input, shape index: {}]   ;;  %s2031_s1 = inlined_call_operand.vmem [shape: bf16[32,128], index: 1, kind: input, shape index: {}]   ;;  %s2032_s2 = inlined_call_operand.vmem [shape: bf16[128,8], index: 2, kind: input, shape index: {}]   ;;  %s2033_s3 = inlined_call_operand.vmem [shape: bf16[8,128], index: 3, kind: input, shape index: {}]   ;;  %s2034_s4 = inlined_call_operand.vmem [shape: f32[1,128], index: 4, kind: input, shape index: {}]   ;;  %s2035_s5 = inlined_call_operand.vmem [shape: f32[1,128], index: 5, kind: input, shape index: {}]   ;;  %s2036_s6 = inlined_call_operand.vmem [shape: bf16[512,128], index: 6, kind: output, shape index: {}]  }
   0x1 LB: > { %s1298_s22 = sadd.s32 4294967295, %s1678_s21   ;;  %p1302_p0 = scmp.ge.s32.totalorder %s1678_s21, 1  ;;  %s1678_s21 = sphi %s1715_s21, %s16_s21  }
   0x2   : > { %p213_p1 = scmp.lt.s32.totalorder %s1678_s21, 5 }
   0x4   : > { %p214_p2 = pnand %p1302_p0, %p213_p1 }
   0x5   : > { %v1622_v0 = vld [vmem:[%s2031_s1] sm:$0xff] (!%p214_p2)   ;;  %s1303_s25 = sshll.u32 (!%p214_p2), %s1298_s22, 4  ;;  %v1623_v1 = vld [vmem:[%s2031_s1 + $0x8] sm:$0xff] (!%p214_p2)   ;;  %vm328_vm0 = vcmask (!%p214_p2), 261120   ;;  %v1751_v4 = vld [vmem:[%s2032_s2 + $0x10] sm:$0xff] (!%p214_p2)   ;;  %vm671_vm1 = vcmask (!%p214_p2), 1043456  }
   0x6   : > { %217 = sbr.rel (%p214_p2) target bundleno = 1161 (0x489), region = 44  ;;  %p244_p3 = scmp.lt.s32.totalorder (!%p214_p2), %s1303_s25, 63  ;;  %1492 = vmatprep.subr.bf16.mxu0 (!%p214_p2), %v1622_v0  ;;  %v1632_v2 = vld [vmem:[%s2032_s2] sm:$0xff] (!%p214_p2)   ;;  %v1737_v3 = vld [vmem:[%s2032_s2 + $0x8] sm:$0xff] (!%p214_p2)   ;;  %v1635_v8 = vld [vmem:[%s2032_s2 + $0x18] sm:$0xff] (!%p214_p2)   ;;  %vm646_vm2 = vcmask (!%p214_p2), 64512  }
   0x7   : > { %1493 = vmatpush3.bf16.msra.mxu0 (!%p214_p2), %v1622_v0  ;;  %1512 = vmatprep.subr.bf16.mxu1 (!%p214_p2), %v1632_v2  ;;  %v1768_v9 = vld [vmem:[%s2032_s2 + $0x20] sm:$0xff] (!%p214_p2)   ;;  %v1777_v12 = vld [vmem:[%s2032_s2 + $0x28] sm:$0xff] (!%p214_p2)   ;;  %v1638_v14 = vld [vmem:[%s2032_s2 + $0x30] sm:$0xff] (!%p214_p2)  }
   0x8   : > { %1494 = vmatprep.subr.bf16.mxu0 (!%p214_p2), %v1623_v1  ;;  %1513 = vmatpush3.bf16.msra.mxu1 (!%p214_p2), %v1632_v2  ;;  %v1639_v17 = vld [vmem:[%s2032_s2 + $0x38] sm:$0xff] (!%p214_p2)   ;;  %v466_v18 = vld [vmem:[%s2033_s3] sm:$0xf] (!%p214_p2) }
   0x9   : > { %1514 = vmatprep.subr.bf16.mxu1 (!%p214_p2), %v1737_v3  ;;  %v1798_v19 = vsel (!%p214_p2), %vm671_vm1, %v466_v18, 0 }
   0xb   : > { %1495 = vmatpush3.bf16.msra.mxu0 (!%p214_p2), %v1623_v1 }
   0xc   : > { %1515 = vmatpush3.bf16.msra.mxu1 (!%p214_p2), %v1737_v3  ;;  %1612 = vmatprep.subr.msk.bf16.mxu0 (!%p214_p2), %vm671_vm1, %v466_v18 }
   0xd   : > { %s2038_s25 = smov (!%p244_p3, %s1303_s25), 63  ;;  %1516 = vmatprep.subr.bf16.mxu1 %v1751_v4 }
   0xe   : > { %s1304_s8 = sshll.u32 %s2038_s25, 2 }
   0xf   : > { %s1745_s11 = scalar_lea.vmem %s2030_s0, %s1304_s8 }
  0x10   : > { %v1624_v5 = vld [vmem:[%s1745_s11] sm:$0xff]   ;;  %v1625_v6 = vld [vmem:[%s1745_s11 + $0x8] sm:$0xff]   ;;  %v1626_v7 = vld [vmem:[%s1745_s11 + $0x10] sm:$0xff]   ;;  %1517 = vmatpush3.bf16.msra.mxu1 %v1751_v4 }
  0x11   : > { %1496 = vmatprep.mubr.msk.bf16.mxu0 %vm328_vm0, %v1624_v5  ;;  %v1627_v10 = vld [vmem:[%s1745_s11 + $0x18] sm:$0xff]   ;;  %1518 = vmatprep.subr.bf16.mxu1 %v1635_v8  ;;  %v1628_v11 = vld [vmem:[%s1745_s11 + $0x20] sm:$0xff]   ;;  %v1629_v13 = vld [vmem:[%s1745_s11 + $0x28] sm:$0xff]  }
  0x12   : > { %1497 = vmatmul.mubr.msk.bf16.vlgmr.msra.gmra.mrb[0].mxu0 %vm328_vm0, %v1625_v6  ;;  %v1630_v15 = vld [vmem:[%s1745_s11 + $0x30] sm:$0xff]   ;;  %v1631_v16 = vld [vmem:[%s1745_s11 + $0x38] sm:$0xff]   ;;  %s1980_s11 = scalar_lea.vmem %s2036_s6, %s1304_s8 }
  0x13   : > { %1500 = vmatprep.mubr.msk.bf16.mxu0 %vm328_vm0, %v1626_v7  ;;  %1545 = vmatpush3.bf16.msra.mxu0 %v1798_v19 }
  0x14   : > { %1519 = vmatpush3.bf16.msra.mxu1 %v1635_v8  ;;  %1613 = vmatprep.subr.msk.bf16.mxu0 %vm671_vm1, %v466_v18 }
  0x15   : > { %1520 = vmatprep.subr.bf16.mxu1 %v1768_v9 }
  0x18   : > { %1521 = vmatpush3.bf16.msra.mxu1 %v1768_v9 }
  0x19   : > { %1522 = vmatprep.subr.bf16.mxu1 %v1777_v12 }
  0x1a   : > { %1501 = vmatmul.mubr.msk.bf16.gmra.mrb[4].mxu0 %vm328_vm0, %v1627_v10 }
  0x1b   : > { %1504 = vmatprep.mubr.msk.bf16.mxu0 %vm328_vm0, %v1628_v11 }
  0x1c   : > { %1523 = vmatpush3.bf16.msra.mxu1 %v1777_v12 }
  0x1d   : > { %1524 = vmatprep.subr.bf16.mxu1 %v1638_v14 }
  0x20   : > { %1525 = vmatpush3.bf16.msra.mxu1 %v1638_v14 }
  0x21   : > { %1526 = vmatprep.subr.bf16.mxu1 %v1639_v17 }
  0x22   : > { %1505 = vmatmul.mubr.msk.bf16.gmra.mrb[8].mxu0 %vm328_vm0, %v1629_v13 }
  0x23   : > { %1508 = vmatprep.mubr.msk.bf16.mxu0 %vm328_vm0, %v1630_v15 }
  0x24   : > { %1527 = vmatpush3.bf16.msra.mxu1 %v1639_v17 }
  0x25   : > { %1562 = vmatprep.subr.bf16.mxu1 %v1632_v2 }
  0x2a   : > { %1509 = vmatmul.mubr.msk.bf16.gmra.mrb[12].mxu0 %vm328_vm0, %v1631_v16 }
  0xe5   : > { %v1801_v20 = vpop.f32.mrb[0].mxu0 }
  0xe6   : > { %v1803_v21 = vpop.f32.mrb[1].mxu0 }
  0xe7   : > { %v1805_v22 = vpop.f32.mrb[2].mxu0 }
  0xe8   : > { %v470_v23 = vpack.c.bf16 %v1805_v22, %v1801_v20  ;;  %v1809_v24 = vpop.f32.mrb[3].mxu0 }
  0xe9   : > { %v469_v25 = vpack.c.bf16 %v1809_v24, %v1803_v21 }
  0xeb   : > { %1528 = vmatprep.mubr.bf16.mxu1 %v469_v25 }
  0xec   : > { %1529 = vmatmul.mubr.bf16.vlgmr.msra.gmra.mrb[0].mxu1 %v470_v23 }
  0xed   : > { %v1813_v26 = vpop.f32.mrb[4].mxu0  ;;  %1563 = vmatpush3.bf16.msra.mxu1 %v1632_v2 }
  0xee   : > { %v1815_v27 = vpop.f32.mrb[5].mxu0  ;;  %1564 = vmatprep.subr.bf16.mxu1 %v1737_v3 }
  0xef   : > { %v1818_v28 = vpop.f32.mrb[6].mxu0 }
  0xf0   : > { %v472_v29 = vpack.c.bf16 %v1818_v28, %v1813_v26  ;;  %v1822_v30 = vpop.f32.mrb[7].mxu0 }
  0xf1   : > { %v471_v31 = vpack.c.bf16 %v1822_v30, %v1815_v27  ;;  %1565 = vmatpush3.bf16.msra.mxu1 %v1737_v3 }
  0xf2   : > { %1566 = vmatprep.subr.bf16.mxu1 %v1751_v4 }
  0xf3   : > { %1532 = vmatprep.mubr.bf16.mxu1 %v471_v31 }
  0xf4   : > { %1533 = vmatmul.mubr.bf16.gmra.mrb[4].mxu1 %v472_v29 }
  0xf5   : > { %v1828_v32 = vpop.f32.mrb[8].mxu0  ;;  %1567 = vmatpush3.bf16.msra.mxu1 %v1751_v4 }
  0xf6   : > { %v1831_v33 = vpop.f32.mrb[9].mxu0  ;;  %1568 = vmatprep.subr.bf16.mxu1 %v1635_v8 }
  0xf7   : > { %v1833_v34 = vpop.f32.mrb[10].mxu0 }
  0xf8   : > { %v474_v35 = vpack.c.bf16 %v1833_v34, %v1828_v32  ;;  %v1837_v36 = vpop.f32.mrb[11].mxu0 }
  0xf9   : > { %v473_v37 = vpack.c.bf16 %v1837_v36, %v1831_v33  ;;  %1569 = vmatpush3.bf16.msra.mxu1 %v1635_v8 }
  0xfa   : > { %1570 = vmatprep.subr.bf16.mxu1 %v1768_v9 }
  0xfb   : > { %1536 = vmatprep.mubr.bf16.mxu1 %v473_v37 }
  0xfc   : > { %1537 = vmatmul.mubr.bf16.gmra.mrb[8].mxu1 %v474_v35 }
  0xfd   : > { %v1842_v38 = vpop.f32.mrb[12].mxu0  ;;  %1571 = vmatpush3.bf16.msra.mxu1 %v1768_v9 }
  0xfe   : > { %v1845_v39 = vpop.f32.mrb[13].mxu0  ;;  %1572 = vmatprep.subr.bf16.mxu1 %v1777_v12 }
  0xff   : > { %v1848_v40 = vpop.f32.mrb[14].mxu0 }
 0x100   : > { %v476_v41 = vpack.c.bf16 %v1848_v40, %v1842_v38  ;;  %v1852_v42 = vpop.f32.mrb[15].mxu0 }
 0x101   : > { %v475_v43 = vpack.c.bf16 %v1852_v42, %v1845_v39  ;;  %1573 = vmatpush3.bf16.msra.mxu1 %v1777_v12 }
 0x102   : > { %1574 = vmatprep.subr.bf16.mxu1 %v1638_v14 }
 0x103   : > { %1540 = vmatprep.mubr.bf16.mxu1 %v475_v43 }
 0x104   : > { %1541 = vmatmul.mubr.bf16.gmra.mrb[12].mxu1 %v476_v41 }
 0x105   : > { %1575 = vmatpush3.bf16.msra.mxu1 %v1638_v14 }
 0x106   : > { %1576 = vmatprep.subr.bf16.mxu1 %v1639_v17 }
 0x109   : > { %1577 = vmatpush3.bf16.msra.mxu1 %v1639_v17 }
 0x1bf   : > { %v1530_v44 = vpop.f32.mrb[0].mxu1 }
 0x1c0   : > { %v559_v45 = vpop.f32.mrb[1].mxu1  ;;  %v624_v47 = vmul.f32 0.03125, %v1530_v44 }
 0x1c1   : > { %v1531_v46 = vpop.f32.mrb[2].mxu1  ;;  %v622_v50 = vmul.f32 0.03125, %v559_v45 }
 0x1c2   : > { %v625_v48 = vmul.f32 0.03125, %v1531_v46  ;;  %v562_v49 = vpop.f32.mrb[3].mxu1 }
 0x1c3   : > { %v623_v51 = vmul.f32 0.03125, %v562_v49 }
 0x1c4   : > { %v639_v52 = vpack.c.bf16 %v625_v48, %v624_v47 }
 0x1c5   : > { %v638_v53 = vpack.c.bf16 %v623_v51, %v622_v50 }
 0x1c7   : > { %v1534_v54 = vpop.f32.mrb[4].mxu1  ;;  %1546 = vmatprep.mubr.msk.bf16.mxu0 %vm646_vm2, %v638_v53 }
 0x1c8   : > { %v575_v55 = vpop.f32.mrb[5].mxu1  ;;  %1547 = vmatmul.mubr.msk.bf16.vlgmr.msra.gmra.mrb[16].mxu0 %vm646_vm2, %v639_v52  ;;  %v628_v57 = vmul.f32 0.03125, %v1534_v54 }
 0x1c9   : > { %v1535_v56 = vpop.f32.mrb[6].mxu1  ;;  %1595 = vmatpush3.bf16.msra.mxu0 %v1798_v19  ;;  %v626_v60 = vmul.f32 0.03125, %v575_v55 }
 0x1ca   : > { %v629_v58 = vmul.f32 0.03125, %v1535_v56  ;;  %v578_v59 = vpop.f32.mrb[7].mxu1 }
 0x1cb   : > { %v627_v61 = vmul.f32 0.03125, %v578_v59 }
 0x1cc   : > { %v641_v62 = vpack.c.bf16 %v629_v58, %v628_v57 }
 0x1cd   : > { %v640_v63 = vpack.c.bf16 %v627_v61, %v626_v60 }
 0x1cf   : > { %v1538_v0 = vpop.f32.mrb[8].mxu1  ;;  %1550 = vmatprep.mubr.msk.bf16.mxu0 %vm646_vm2, %v640_v63 }
 0x1d0   : > { %v591_v1 = vpop.f32.mrb[9].mxu1  ;;  %1551 = vmatmul.mubr.msk.bf16.gmra.mrb[20].mxu0 %vm646_vm2, %v641_v62  ;;  %v632_v3 = vmul.f32 0.03125, %v1538_v0 }
 0x1d1   : > { %v1539_v2 = vpop.f32.mrb[10].mxu1  ;;  %v630_v6 = vmul.f32 0.03125, %v591_v1 }
 0x1d2   : > { %v633_v4 = vmul.f32 0.03125, %v1539_v2  ;;  %v594_v5 = vpop.f32.mrb[11].mxu1 }
 0x1d3   : > { %v631_v7 = vmul.f32 0.03125, %v594_v5 }
 0x1d4   : > { %v643_v8 = vpack.c.bf16 %v633_v4, %v632_v3 }
 0x1d5   : > { %v642_v9 = vpack.c.bf16 %v631_v7, %v630_v6 }
 0x1d7   : > { %v1542_v10 = vpop.f32.mrb[12].mxu1  ;;  %1554 = vmatprep.mubr.msk.bf16.mxu0 %vm646_vm2, %v642_v9 }
 0x1d8   : > { %v607_v11 = vpop.f32.mrb[13].mxu1  ;;  %1555 = vmatmul.mubr.msk.bf16.gmra.mrb[24].mxu0 %vm646_vm2, %v643_v8  ;;  %v636_v13 = vmul.f32 0.03125, %v1542_v10 }
 0x1d9   : > { %v1543_v12 = vpop.f32.mrb[14].mxu1  ;;  %v634_v16 = vmul.f32 0.03125, %v607_v11 }
 0x1da   : > { %v637_v14 = vmul.f32 0.03125, %v1543_v12  ;;  %v610_v15 = vpop.f32.mrb[15].mxu1 }
 0x1db   : > { %v635_v17 = vmul.f32 0.03125, %v610_v15 }
 0x1dc   : > { %v645_v18 = vpack.c.bf16 %v637_v14, %v636_v13 }
 0x1dd   : > { %v644_v19 = vpack.c.bf16 %v635_v17, %v634_v16 }
 0x1df   : > { %1558 = vmatprep.mubr.msk.bf16.mxu0 %vm646_vm2, %v644_v19 }
 0x1e0   : > { %1559 = vmatmul.mubr.msk.bf16.gmra.mrb[28].mxu0 %vm646_vm2, %v645_v18 }
 0x29b   : > { %v1548_v23 = vpop.f32.mrb[16].mxu0 }
 0x29c   : > { %v1867_v25 = vsub.f32 %v1801_v20, %v1548_v23  ;;  %v709_v29 = vpop.f32.mrb[17].mxu0 }
 0x29d   : > { %v1870_v31 = vsub.f32 %v1803_v21, %v709_v29  ;;  %v1549_v35 = vpop.f32.mrb[18].mxu0 }
 0x29e   : > { %v1873_v37 = vsub.f32 %v1805_v22, %v1549_v35  ;;  %v712_v41 = vpop.f32.mrb[19].mxu0  ;;  %v790_v21 = vmul.f32 %v1867_v25, %v1867_v25 }
 0x29f   : > { %v1876_v43 = vsub.f32 %v1809_v24, %v712_v41  ;;  %v788_v45 = vmul.f32 %v1870_v31, %v1870_v31 }
 0x2a0   : > { %v791_v44 = vmul.f32 %v1873_v37, %v1873_v37 }
 0x2a1   : > { %v789_v20 = vmul.f32 %v1876_v43, %v1876_v43 }
 0x2a2   : > { %v805_v22 = vpack.c.bf16 %v791_v44, %v790_v21 }
 0x2a3   : > { %v1552_v46 = vpop.f32.mrb[20].mxu0  ;;  %v804_v47 = vpack.c.bf16 %v789_v20, %v788_v45 }
 0x2a4   : > { %v1887_v48 = vsub.f32 %v1813_v26, %v1552_v46  ;;  %v725_v24 = vpop.f32.mrb[21].mxu0 }
 0x2a5   : > { %v1890_v49 = vsub.f32 %v1815_v27, %v725_v24  ;;  %v1553_v50 = vpop.f32.mrb[22].mxu0  ;;  %1578 = vmatprep.mubr.bf16.mxu1 %v804_v47 }
 0x2a6   : > { %v1893_v51 = vsub.f32 %v1818_v28, %v1553_v50  ;;  %v728_v52 = vpop.f32.mrb[23].mxu0  ;;  %1579 = vmatmul.mubr.bf16.vlgmr.msra.gmra.mrb[16].mxu1 %v805_v22  ;;  %v794_v55 = vmul.f32 %v1887_v48, %v1887_v48 }
 0x2a7   : > { %v1896_v53 = vsub.f32 %v1822_v30, %v728_v52  ;;  %v792_v26 = vmul.f32 %v1890_v49, %v1890_v49 }
 0x2a8   : > { %v795_v54 = vmul.f32 %v1893_v51, %v1893_v51 }
 0x2a9   : > { %v793_v27 = vmul.f32 %v1896_v53, %v1896_v53 }
 0x2aa   : > { %v807_v30 = vpack.c.bf16 %v795_v54, %v794_v55 }
 0x2ab   : > { %v1556_v56 = vpop.f32.mrb[24].mxu0  ;;  %v806_v28 = vpack.c.bf16 %v793_v27, %v792_v26 }
 0x2ac   : > { %v1907_v57 = vsub.f32 %v1828_v32, %v1556_v56  ;;  %v741_v58 = vpop.f32.mrb[25].mxu0 }
 0x2ad   : > { %v1910_v59 = vsub.f32 %v1831_v33, %v741_v58  ;;  %v1557_v60 = vpop.f32.mrb[26].mxu0  ;;  %1582 = vmatprep.mubr.bf16.mxu1 %v806_v28 }
 0x2ae   : > { %v1913_v61 = vsub.f32 %v1833_v34, %v1557_v60  ;;  %v744_v62 = vpop.f32.mrb[27].mxu0  ;;  %1583 = vmatmul.mubr.bf16.gmra.mrb[20].mxu1 %v807_v30  ;;  %v798_v1 = vmul.f32 %v1907_v57, %v1907_v57 }
 0x2af   : > { %v1916_v63 = vsub.f32 %v1837_v36, %v744_v62  ;;  %v796_v32 = vmul.f32 %v1910_v59, %v1910_v59 }
 0x2b0   : > { %v799_v0 = vmul.f32 %v1913_v61, %v1913_v61 }
 0x2b1   : > { %v797_v33 = vmul.f32 %v1916_v63, %v1916_v63 }
 0x2b2   : > { %v809_v36 = vpack.c.bf16 %v799_v0, %v798_v1 }
 0x2b3   : > { %v1560_v2 = vpop.f32.mrb[28].mxu0  ;;  %v808_v34 = vpack.c.bf16 %v797_v33, %v796_v32 }
 0x2b4   : > { %v1927_v3 = vsub.f32 %v1842_v38, %v1560_v2  ;;  %v757_v4 = vpop.f32.mrb[29].mxu0 }
 0x2b5   : > { %v1930_v5 = vsub.f32 %v1845_v39, %v757_v4  ;;  %v1561_v6 = vpop.f32.mrb[30].mxu0  ;;  %1586 = vmatprep.mubr.bf16.mxu1 %v808_v34 }
 0x2b6   : > { %v1933_v7 = vsub.f32 %v1848_v40, %v1561_v6  ;;  %v760_v8 = vpop.f32.mrb[31].mxu0  ;;  %1587 = vmatmul.mubr.bf16.gmra.mrb[24].mxu1 %v809_v36  ;;  %v802_v11 = vmul.f32 %v1927_v3, %v1927_v3 }
 0x2b7   : > { %v1936_v9 = vsub.f32 %v1852_v42, %v760_v8  ;;  %v800_v38 = vmul.f32 %v1930_v5, %v1930_v5 }
 0x2b8   : > { %v803_v10 = vmul.f32 %v1933_v7, %v1933_v7 }
 0x2b9   : > { %v801_v39 = vmul.f32 %v1936_v9, %v1936_v9 }
 0x2ba   : > { %v811_v40 = vpack.c.bf16 %v803_v10, %v802_v11 }
 0x2bb   : > { %v810_v12 = vpack.c.bf16 %v801_v39, %v800_v38 }
 0x2bd   : > { %1590 = vmatprep.mubr.bf16.mxu1 %v810_v12 }
 0x2be   : > { %1591 = vmatmul.mubr.bf16.gmra.mrb[28].mxu1 %v811_v40 }
 0x379   : > { %v1580_v13 = vpop.f32.mrb[16].mxu1 }
 0x37a   : > { %v846_v14 = vpop.f32.mrb[17].mxu1  ;;  %v911_v15 = vmul.f32 0.03125, %v1580_v13 }
 0x37b   : > { %v1581_v42 = vpop.f32.mrb[18].mxu1  ;;  %v909_v18 = vmul.f32 0.03125, %v846_v14 }
 0x37c   : > { %v912_v16 = vmul.f32 0.03125, %v1581_v42  ;;  %v849_v17 = vpop.f32.mrb[19].mxu1 }
 0x37d   : > { %v910_v19 = vmul.f32 0.03125, %v849_v17 }
 0x37e   : > { %v926_v23 = vpack.c.bf16 %v912_v16, %v911_v15 }
 0x37f   : > { %v925_v29 = vpack.c.bf16 %v910_v19, %v909_v18 }
 0x381   : > { %v1584_v35 = vpop.f32.mrb[20].mxu1  ;;  %1596 = vmatprep.mubr.msk.bf16.mxu0 %vm646_vm2, %v925_v29 }
 0x382   : > { %v862_v41 = vpop.f32.mrb[21].mxu1  ;;  %1597 = vmatmul.mubr.msk.bf16.vlgmr.msra.gmra.mrb[32].mxu0 %vm646_vm2, %v926_v23  ;;  %v915_v45 = vmul.f32 0.03125, %v1584_v35 }
 0x383   : > { %v1585_v44 = vpop.f32.mrb[22].mxu1  ;;  %v913_v46 = vmul.f32 0.03125, %v862_v41 }
 0x384   : > { %v916_v20 = vmul.f32 0.03125, %v1585_v44  ;;  %v865_v21 = vpop.f32.mrb[23].mxu1 }
 0x385   : > { %v914_v47 = vmul.f32 0.03125, %v865_v21 }
 0x386   : > { %v928_v22 = vpack.c.bf16 %v916_v20, %v915_v45 }
 0x387   : > { %v927_v24 = vpack.c.bf16 %v914_v47, %v913_v46  ;;  %v1957_v47 = vld [vmem:[%s2034_s4] ss:$0 sm:$0xff] }
 0x389   : > { %v1588_v50 = vpop.f32.mrb[24].mxu1  ;;  %1600 = vmatprep.mubr.msk.bf16.mxu0 %vm646_vm2, %v927_v24 }
 0x38a   : > { %v878_v52 = vpop.f32.mrb[25].mxu1  ;;  %1601 = vmatmul.mubr.msk.bf16.gmra.mrb[36].mxu0 %vm646_vm2, %v928_v22  ;;  %v919_v26 = vmul.f32 0.03125, %v1588_v50 }
 0x38b   : > { %v1589_v54 = vpop.f32.mrb[26].mxu1  ;;  %v917_v56 = vmul.f32 0.03125, %v878_v52 }
 0x38c   : > { %v920_v27 = vmul.f32 0.03125, %v1589_v54  ;;  %v881_v55 = vpop.f32.mrb[27].mxu1 }
 0x38d   : > { %v918_v28 = vmul.f32 0.03125, %v881_v55 }
 0x38e   : > { %v930_v58 = vpack.c.bf16 %v920_v27, %v919_v26 }
 0x38f   : > { %v929_v30 = vpack.c.bf16 %v918_v28, %v917_v56 }
 0x391   : > { %v1592_v60 = vpop.f32.mrb[28].mxu1  ;;  %1604 = vmatprep.mubr.msk.bf16.mxu0 %vm646_vm2, %v929_v30 }
 0x392   : > { %v894_v62 = vpop.f32.mrb[29].mxu1  ;;  %1605 = vmatmul.mubr.msk.bf16.gmra.mrb[40].mxu0 %vm646_vm2, %v930_v58  ;;  %v923_v32 = vmul.f32 0.03125, %v1592_v60  ;;  %v1966_v60 = vld [vmem:[%s2035_s5] ss:$0 sm:$0xff] }
 0x393   : > { %v1593_v0 = vpop.f32.mrb[30].mxu1  ;;  %v921_v2 = vmul.f32 0.03125, %v894_v62 }
 0x394   : > { %v924_v33 = vmul.f32 0.03125, %v1593_v0  ;;  %v897_v1 = vpop.f32.mrb[31].mxu1 }
 0x395   : > { %v922_v34 = vmul.f32 0.03125, %v897_v1 }
 0x396   : > { %v932_v4 = vpack.c.bf16 %v924_v33, %v923_v32 }
 0x397   : > { %v931_v36 = vpack.c.bf16 %v922_v34, %v921_v2 }
 0x399   : > { %1608 = vmatprep.mubr.msk.bf16.mxu0 %vm646_vm2, %v931_v36 }
 0x39a   : > { %1609 = vmatmul.mubr.msk.bf16.gmra.mrb[44].mxu0 %vm646_vm2, %v932_v4 }
 0x455   : > { %v1598_v6 = vpop.f32.mrb[32].mxu0 }
 0x456   : > { %v1056_v8 = vmax.f32 %v1598_v6, 0.0  ;;  %v991_v10 = vpop.f32.mrb[33].mxu0 }
 0x457   : > { %v1054_v38 = vmax.f32 %v991_v10, 0.0  ;;  %v1599_v39 = vpop.f32.mrb[34].mxu0 }
 0x458   : > { %v1072_v11 = vadd.f32 1e-05, %v1056_v8  ;;  %v1057_v12 = vmax.f32 %v1599_v39, 0.0  ;;  %v994_v40 = vpop.f32.mrb[35].mxu0 }
 0x459   : > { %v1070_v13 = vadd.f32 1e-05, %v1054_v38  ;;  %v1055_v14 = vmax.f32 %v994_v40, 0.0 }
 0x45a   : > { %1640 = vrsqrt.f32 %v1072_v11  ;;  %v1073_v42 = vadd.f32 1e-05, %v1057_v12 }
 0x45b   : > { %1642 = vrsqrt.f32 %v1070_v13  ;;  %v1071_v15 = vadd.f32 1e-05, %v1055_v14 }
 0x45c   : > { %1644 = vrsqrt.f32 %v1073_v42 }
 0x45d   : > { %1646 = vrsqrt.f32 %v1071_v15  ;;  %v1602_v16 = vpop.f32.mrb[36].mxu0 }
 0x45e   : > { %v1060_v17 = vmax.f32 %v1602_v16, 0.0  ;;  %v1007_v18 = vpop.f32.mrb[37].mxu0 }
 0x45f   : > { %v1058_v19 = vmax.f32 %v1007_v18, 0.0  ;;  %v1603_v23 = vpop.f32.mrb[38].mxu0 }
 0x460   : > { %v1076_v29 = vadd.f32 1e-05, %v1060_v17  ;;  %v1061_v35 = vmax.f32 %v1603_v23, 0.0  ;;  %v1010_v41 = vpop.f32.mrb[39].mxu0 }
 0x461   : > { %v1074_v44 = vadd.f32 1e-05, %v1058_v19  ;;  %v1059_v45 = vmax.f32 %v1010_v41, 0.0 }
 0x462   : > { %1648 = vrsqrt.f32 %v1076_v29  ;;  %v1077_v20 = vadd.f32 1e-05, %v1061_v35 }
 0x463   : > { %1650 = vrsqrt.f32 %v1074_v44  ;;  %v1075_v21 = vadd.f32 1e-05, %v1059_v45 }
 0x464   : > { %v1641_v46 = vpop.eup %1640  ;;  %1652 = vrsqrt.f32 %v1077_v20 }
 0x465   : > { %v1643_v22 = vpop.eup %1642  ;;  %v1104_v24 = vmul.f32 %v1641_v46, %v1867_v25  ;;  %1654 = vrsqrt.f32 %v1075_v21  ;;  %v1606_v50 = vpop.f32.mrb[40].mxu0 }
 0x466   : > { %v1645_v52 = vpop.eup %1644  ;;  %v1102_v54 = vmul.f32 %v1643_v22, %v1870_v31  ;;  %v1064_v26 = vmax.f32 %v1606_v50, 0.0  ;;  %v1023_v27 = vpop.f32.mrb[41].mxu0 }
 0x467   : > { %v1647_v55 = vpop.eup %1646  ;;  %v1126_v56 = vmul.f32 %v1957_v47, %v1104_v24  ;;  %v1105_v28 = vmul.f32 %v1645_v52, %v1873_v37  ;;  %v1062_v58 = vmax.f32 %v1023_v27, 0.0  ;;  %v1607_v30 = vpop.f32.mrb[42].mxu0 }
 0x468   : > { %v1124_v25 = vmul.f32 %v1957_v47, %v1102_v54  ;;  %v1103_v62 = vmul.f32 %v1647_v55, %v1876_v43  ;;  %v1080_v31 = vadd.f32 1e-05, %v1064_v26  ;;  %v1065_v0 = vmax.f32 %v1607_v30, 0.0  ;;  %v1026_v32 = vpop.f32.mrb[43].mxu0 }
 0x469   : > { %v1127_v33 = vmul.f32 %v1957_v47, %v1105_v28  ;;  %v1078_v1 = vadd.f32 1e-05, %v1062_v58  ;;  %v1063_v2 = vmax.f32 %v1026_v32, 0.0  ;;  %v1148_v4 = vadd.f32 %v1966_v60, %v1126_v56 }
 0x46a   : > { %v1125_v37 = vmul.f32 %v1957_v47, %v1103_v62  ;;  %1656 = vrsqrt.f32 %v1080_v31  ;;  %v1081_v34 = vadd.f32 1e-05, %v1065_v0  ;;  %v1146_v43 = vadd.f32 %v1966_v60, %v1124_v25 }
 0x46b   : > { %v1149_v36 = vadd.f32 %v1966_v60, %v1127_v33  ;;  %1658 = vrsqrt.f32 %v1078_v1  ;;  %v1079_v6 = vadd.f32 1e-05, %v1063_v2 }
 0x46c   : > { %v1649_v8 = vpop.eup %1648  ;;  %v1147_v10 = vadd.f32 %v1966_v60, %v1125_v37  ;;  %1660 = vrsqrt.f32 %v1081_v34 }
 0x46d   : > { %v1651_v38 = vpop.eup %1650  ;;  %v1393_v39 = vpack.c.bf16 %v1149_v36, %v1148_v4  ;;  %v1108_v11 = vmul.f32 %v1649_v8, %v1887_v48  ;;  %1662 = vrsqrt.f32 %v1079_v6  ;;  %v1610_v12 = vpop.f32.mrb[44].mxu0 }
 0x46e   : > { %v1653_v40 = vpop.eup %1652  ;;  %v1388_v13 = vpack.c.bf16 %v1147_v10, %v1146_v43  ;;  %v1106_v14 = vmul.f32 %v1651_v38, %v1890_v49  ;;  %v1068_v42 = vmax.f32 %v1610_v12, 0.0  ;;  %v1039_v15 = vpop.f32.mrb[45].mxu0 }
 0x46f   : > { %v1655_v16 = vpop.eup %1654  ;;  %1425 = vst [vmem:[%s1980_s11 + $0x8] sm:$0xff] %v1393_v39   ;;  %v1130_v17 = vmul.f32 %v1957_v47, %v1108_v11  ;;  %v1109_v18 = vmul.f32 %v1653_v40, %v1893_v51  ;;  %v1066_v19 = vmax.f32 %v1039_v15, 0.0  ;;  %v1611_v23 = vpop.f32.mrb[46].mxu0 }
 0x470   : > { %1389 = vst [vmem:[%s1980_s11] sm:$0xff] %v1388_v13   ;;  %v1128_v29 = vmul.f32 %v1957_v47, %v1106_v14  ;;  %v1107_v48 = vmul.f32 %v1655_v16, %v1896_v53  ;;  %v1084_v35 = vadd.f32 1e-05, %v1068_v42  ;;  %v1069_v41 = vmax.f32 %v1611_v23, 0.0  ;;  %v1042_v44 = vpop.f32.mrb[47].mxu0 }
 0x471   : > { %v1131_v49 = vmul.f32 %v1957_v47, %v1109_v18  ;;  %v1082_v45 = vadd.f32 1e-05, %v1066_v19  ;;  %v1067_v20 = vmax.f32 %v1042_v44, 0.0  ;;  %v1152_v51 = vadd.f32 %v1966_v60, %v1130_v17 }
 0x472   : > { %v1129_v21 = vmul.f32 %v1957_v47, %v1107_v48  ;;  %1664 = vrsqrt.f32 %v1084_v35  ;;  %v1085_v46 = vadd.f32 1e-05, %v1069_v41  ;;  %v1150_v50 = vadd.f32 %v1966_v60, %v1128_v29 }
 0x473   : > { %v1153_v22 = vadd.f32 %v1966_v60, %v1131_v49  ;;  %1666 = vrsqrt.f32 %v1082_v45  ;;  %v1083_v24 = vadd.f32 1e-05, %v1067_v20 }
 0x474   : > { %v1657_v53 = vpop.eup %1656  ;;  %v1151_v52 = vadd.f32 %v1966_v60, %v1129_v21  ;;  %1668 = vrsqrt.f32 %v1085_v46 }
 0x475   : > { %v1659_v54 = vpop.eup %1658  ;;  %v1403_v26 = vpack.c.bf16 %v1153_v22, %v1152_v51  ;;  %v1112_v27 = vmul.f32 %v1657_v53, %v1907_v57  ;;  %1670 = vrsqrt.f32 %v1083_v24 }
 0x476   : > { %v1661_v55 = vpop.eup %1660  ;;  %v1398_v56 = vpack.c.bf16 %v1151_v52, %v1150_v50  ;;  %v1110_v28 = vmul.f32 %v1659_v54, %v1910_v59 }
 0x477   : > { %v1663_v58 = vpop.eup %1662  ;;  %1427 = vst [vmem:[%s1980_s11 + $0x18] sm:$0xff] %v1403_v26   ;;  %v1134_v30 = vmul.f32 %v1957_v47, %v1112_v27  ;;  %v1113_v25 = vmul.f32 %v1661_v55, %v1913_v61 }
 0x478   : > { %1426 = vst [vmem:[%s1980_s11 + $0x10] sm:$0xff] %v1398_v56   ;;  %v1132_v62 = vmul.f32 %v1957_v47, %v1110_v28  ;;  %v1111_v31 = vmul.f32 %v1663_v58, %v1916_v63 }
 0x479   : > { %v1135_v0 = vmul.f32 %v1957_v47, %v1113_v25  ;;  %v1156_v32 = vadd.f32 %v1966_v60, %v1134_v30 }
 0x47a   : > { %v1133_v57 = vmul.f32 %v1957_v47, %v1111_v31  ;;  %v1154_v1 = vadd.f32 %v1966_v60, %v1132_v62 }
 0x47b   : > { %v1157_v59 = vadd.f32 %v1966_v60, %v1135_v0 }
 0x47c   : > { %v1665_v33 = vpop.eup %1664  ;;  %v1155_v61 = vadd.f32 %v1966_v60, %v1133_v57 }
 0x47d   : > { %v1667_v2 = vpop.eup %1666  ;;  %v1413_v37 = vpack.c.bf16 %v1157_v59, %v1156_v32  ;;  %v1116_v34 = vmul.f32 %v1665_v33, %v1927_v3 }
 0x47e   : > { %v1669_v4 = vpop.eup %1668  ;;  %v1408_v63 = vpack.c.bf16 %v1155_v61, %v1154_v1  ;;  %v1114_v36 = vmul.f32 %v1667_v2, %v1930_v5 }
 0x47f   : > { %v1671_v6 = vpop.eup %1670  ;;  %1429 = vst [vmem:[%s1980_s11 + $0x28] sm:$0xff] %v1413_v37   ;;  %v1138_v8 = vmul.f32 %v1957_v47, %v1116_v34  ;;  %v1117_v43 = vmul.f32 %v1669_v4, %v1933_v7 }
 0x480   : > { %1428 = vst [vmem:[%s1980_s11 + $0x20] sm:$0xff] %v1408_v63   ;;  %v1136_v10 = vmul.f32 %v1957_v47, %v1114_v36  ;;  %v1115_v38 = vmul.f32 %v1671_v6, %v1936_v9 }
 0x481   : > { %v1139_v39 = vmul.f32 %v1957_v47, %v1117_v43  ;;  %v1160_v11 = vadd.f32 %v1966_v60, %v1138_v8 }
 0x482   : > { %v1137_v3 = vmul.f32 %v1957_v47, %v1115_v38  ;;  %v1158_v12 = vadd.f32 %v1966_v60, %v1136_v10 }
 0x483   : > { %v1161_v5 = vadd.f32 %v1966_v60, %v1139_v39 }
 0x484   : > { %v1159_v40 = vadd.f32 %v1966_v60, %v1137_v3 }
 0x485   : > { %v1423_v13 = vpack.c.bf16 %v1161_v5, %v1160_v11 }
 0x486   : > { %v1418_v14 = vpack.c.bf16 %v1159_v40, %v1158_v12 }
 0x487   : > { %1431 = vst [vmem:[%s1980_s11 + $0x38] sm:$0xff] %v1423_v13  }
 0x488   : > { %1430 = vst [vmem:[%s1980_s11 + $0x30] sm:$0xff] %v1418_v14  }
 0x489 PF: > { %s16_s21 = sadd.s32 1, %s1678_s21  }
 0x48a   : > { %p13_p4 = scmp.ge.s32.totalorder %s16_s21, 6  }
 0x48c   :  { %15 = sbr.rel (!%p13_p4) target bundleno = 1 (0x1), region = 74 }

// kernel: patch_expanding_2d_3d.3
= control target key start
LH: loop header
LB: loop body
LE: loop exit
PB: predicated region body
PF: predicated region fallthrough
CT: control target
= control target key end

     0   :  { %s2741_s21 = smov 0   ;;  %s3305_s0 = inlined_call_operand.vmem [shape: bf16[1024,64], index: 0, kind: input, shape index: {}]   ;;  %s3306_s1 = inlined_call_operand.vmem [shape: bf16[64,128], index: 1, kind: input, shape index: {}]   ;;  %s3307_s2 = inlined_call_operand.vmem [shape: bf16[128,8], index: 2, kind: input, shape index: {}]   ;;  %s3308_s3 = inlined_call_operand.vmem [shape: bf16[8,128], index: 3, kind: input, shape index: {}]   ;;  %s3309_s4 = inlined_call_operand.vmem [shape: f32[1,128], index: 4, kind: input, shape index: {}]   ;;  %s3310_s5 = inlined_call_operand.vmem [shape: f32[1,128], index: 5, kind: input, shape index: {}]   ;;  %s3311_s6 = inlined_call_operand.vmem [shape: bf16[1024,128], index: 6, kind: output, shape index: {}]  }
   0x1 LB: > { %s2034_s22 = sadd.s32 4294967295, %s2704_s21   ;;  %p2038_p0 = scmp.ge.s32.totalorder %s2704_s21, 1  ;;  %s2704_s21 = sphi %s2741_s21, %s16_s21  }
   0x2   : > { %p213_p1 = scmp.lt.s32.totalorder %s2704_s21, 5 }
   0x4   : > { %p214_p2 = pnand %p2038_p0, %p213_p1 }
   0x5   : > { %v2606_v0 = vld [vmem:[%s3306_s1] sm:$0xff] (!%p214_p2)   ;;  %s2039_s25 = sshll.u32 (!%p214_p2), %s2034_s22, 5  ;;  %v2607_v1 = vld [vmem:[%s3306_s1 + $0x8] sm:$0xff] (!%p214_p2)   ;;  %v2608_v2 = vld [vmem:[%s3306_s1 + $0x10] sm:$0xff] (!%p214_p2)   ;;  %vm400_vm0 = vcmask (!%p214_p2), 523264   ;;  %vm951_vm1 = vcmask (!%p214_p2), 1043456  }
   0x6   : > { %217 = sbr.rel (%p214_p2) target bundleno = 1197 (0x4ad), region = 44  ;;  %p244_p3 = scmp.lt.s32.totalorder (!%p214_p2), %s2039_s25, 127  ;;  %2384 = vmatprep.subr.bf16.mxu0 (!%p214_p2), %v2606_v0  ;;  %2588 = vmatprep.subr.bf16.mxu1 (!%p214_p2), %v2606_v0  ;;  %v2609_v4 = vld [vmem:[%s3306_s1 + $0x18] sm:$0xff] (!%p214_p2)   ;;  %v2776_v5 = vld [vmem:[%s3307_s2] sm:$0xff] (!%p214_p2)   ;;  %v2784_v9 = vld [vmem:[%s3307_s2 + $0x8] sm:$0xff] (!%p214_p2)   ;;  %vm902_vm2 = vcmask (!%p214_p2), 64512  }
   0x7   : > { %2385 = vmatpush3.bf16.msra.mxu0 (!%p214_p2), %v2606_v0  ;;  %2592 = vmatpush3.bf16.msra.mxu1 (!%p214_p2), %v2606_v0  ;;  %v2797_v12 = vld [vmem:[%s3307_s2 + $0x10] sm:$0xff] (!%p214_p2)   ;;  %v2810_v17 = vld [vmem:[%s3307_s2 + $0x18] sm:$0xff] (!%p214_p2)   ;;  %v2821_v18 = vld [vmem:[%s3307_s2 + $0x20] sm:$0xff] (!%p214_p2)  }
   0x8   : > { %2386 = vmatprep.subr.bf16.mxu0 (!%p214_p2), %v2607_v1  ;;  %2589 = vmatprep.subr.bf16.mxu1 (!%p214_p2), %v2607_v1  ;;  %v2832_v23 = vld [vmem:[%s3307_s2 + $0x28] sm:$0xff] (!%p214_p2)   ;;  %v2843_v24 = vld [vmem:[%s3307_s2 + $0x30] sm:$0xff] (!%p214_p2)   ;;  %v2855_v27 = vld [vmem:[%s3307_s2 + $0x38] sm:$0xff] (!%p214_p2)  }
   0x9   : > { %v626_v28 = vld [vmem:[%s3308_s3] sm:$0xf] (!%p214_p2) }
   0xa   : > { %v2863_v29 = vsel (!%p214_p2), %vm951_vm1, %v626_v28, 0 }
   0xb   : > { %2387 = vmatpush3.bf16.msra.mxu0 (!%p214_p2), %v2607_v1  ;;  %2593 = vmatpush3.bf16.msra.mxu1 (!%p214_p2), %v2607_v1 }
   0xc   : > { %2388 = vmatprep.subr.bf16.mxu0 (!%p214_p2), %v2608_v2  ;;  %2590 = vmatprep.subr.bf16.mxu1 (!%p214_p2), %v2608_v2 }
   0xd   : > { %s3313_s25 = smov (!%p244_p3, %s2039_s25), 127 }
   0xe   : > { %s2040_s30 = sshll.u32 %s3313_s25, 2 }
   0xf   : > { %s2766_s9 = scalar_lea.vmem %s3305_s0, %s2040_s30  ;;  %2389 = vmatpush3.bf16.msra.mxu0 %v2608_v2  ;;  %2594 = vmatpush3.bf16.msra.mxu1 %v2608_v2  ;;  %s3199_s15 = scalar_lea.vmem %s3311_s6, %s2040_s30 }
  0x10   : > { %v2610_v3 = vld [vmem:[%s2766_s9] sm:$0xff]   ;;  %2390 = vmatprep.subr.bf16.mxu0 %v2609_v4  ;;  %2591 = vmatprep.subr.bf16.mxu1 %v2609_v4  ;;  %v2611_v6 = vld [vmem:[%s2766_s9 + $0x8] sm:$0xff]   ;;  %v2612_v7 = vld [vmem:[%s2766_s9 + $0x10] sm:$0xff]  }
  0x11   : > { %2392 = vmatprep.mubr.msk.bf16.mxu0 %vm400_vm0, %v2610_v3  ;;  %v2618_v8 = vld [vmem:[%s2766_s9 + $0x40] sm:$0xff]   ;;  %v2619_v10 = vld [vmem:[%s2766_s9 + $0x48] sm:$0xff]   ;;  %v2620_v11 = vld [vmem:[%s2766_s9 + $0x50] sm:$0xff]  }
  0x12   : > { %2408 = vmatprep.mubr.msk.bf16.mxu1 %vm400_vm0, %v2618_v8  ;;  %v2613_v13 = vld [vmem:[%s2766_s9 + $0x18] sm:$0xff]   ;;  %v2614_v14 = vld [vmem:[%s2766_s9 + $0x20] sm:$0xff]   ;;  %v2615_v19 = vld [vmem:[%s2766_s9 + $0x28] sm:$0xff]  }
  0x13   : > { %2391 = vmatpush3.bf16.msra.mxu0 %v2609_v4  ;;  %2595 = vmatpush3.bf16.msra.mxu1 %v2609_v4  ;;  %v2621_v15 = vld [vmem:[%s2766_s9 + $0x58] sm:$0xff]   ;;  %v2622_v16 = vld [vmem:[%s2766_s9 + $0x60] sm:$0xff]   ;;  %v2623_v20 = vld [vmem:[%s2766_s9 + $0x68] sm:$0xff]  }
  0x14   : > { %2424 = vmatprep.subr.bf16.mxu1 %v2776_v5  ;;  %v2616_v21 = vld [vmem:[%s2766_s9 + $0x30] sm:$0xff]   ;;  %v2617_v25 = vld [vmem:[%s2766_s9 + $0x38] sm:$0xff]   ;;  %2596 = vmatprep.subr.msk.bf16.mxu0 %vm951_vm1, %v626_v28 }
  0x15   : > { %v2624_v22 = vld [vmem:[%s2766_s9 + $0x70] sm:$0xff]   ;;  %v2625_v26 = vld [vmem:[%s2766_s9 + $0x78] sm:$0xff]  }
  0x16   : > { %2393 = vmatmul.mubr.msk.bf16.vlgmr.msra.gmra.mrb[0].mxu0 %vm400_vm0, %v2611_v6  ;;  %2409 = vmatmul.mubr.msk.bf16.vlgmr.msra.gmra.mrb[0].mxu1 %vm400_vm0, %v2619_v10 }
  0x17   : > { %2396 = vmatprep.mubr.msk.bf16.mxu0 %vm400_vm0, %v2612_v7  ;;  %2412 = vmatprep.mubr.msk.bf16.mxu1 %vm400_vm0, %v2620_v11 }
  0x18   : > { %2425 = vmatpush3.bf16.msra.mxu1 %v2776_v5  ;;  %2473 = vmatpush3.bf16.msra.mxu0 %v2863_v29 }
  0x19   : > { %2426 = vmatprep.subr.bf16.mxu1 %v2784_v9  ;;  %2597 = vmatprep.subr.msk.bf16.mxu0 %vm951_vm1, %v626_v28 }
  0x1c   : > { %2427 = vmatpush3.bf16.msra.mxu1 %v2784_v9 }
  0x1d   : > { %2428 = vmatprep.subr.bf16.mxu1 %v2797_v12 }
  0x1e   : > { %2397 = vmatmul.mubr.msk.bf16.gmra.mrb[4].mxu0 %vm400_vm0, %v2613_v13  ;;  %2413 = vmatmul.mubr.msk.bf16.gmra.mrb[4].mxu1 %vm400_vm0, %v2621_v15 }
  0x1f   : > { %2400 = vmatprep.mubr.msk.bf16.mxu0 %vm400_vm0, %v2614_v14  ;;  %2416 = vmatprep.mubr.msk.bf16.mxu1 %vm400_vm0, %v2622_v16 }
  0x20   : > { %2429 = vmatpush3.bf16.msra.mxu1 %v2797_v12 }
  0x21   : > { %2430 = vmatprep.subr.bf16.mxu1 %v2810_v17 }
  0x24   : > { %2431 = vmatpush3.bf16.msra.mxu1 %v2810_v17 }
  0x25   : > { %2432 = vmatprep.subr.bf16.mxu1 %v2821_v18 }
  0x26   : > { %2401 = vmatmul.mubr.msk.bf16.gmra.mrb[8].mxu0 %vm400_vm0, %v2615_v19  ;;  %2417 = vmatmul.mubr.msk.bf16.gmra.mrb[8].mxu1 %vm400_vm0, %v2623_v20 }
  0x27   : > { %2404 = vmatprep.mubr.msk.bf16.mxu0 %vm400_vm0, %v2616_v21  ;;  %2420 = vmatprep.mubr.msk.bf16.mxu1 %vm400_vm0, %v2624_v22 }
  0x28   : > { %2433 = vmatpush3.bf16.msra.mxu1 %v2821_v18 }
  0x29   : > { %2434 = vmatprep.subr.bf16.mxu1 %v2832_v23 }
  0x2c   : > { %2435 = vmatpush3.bf16.msra.mxu1 %v2832_v23 }
  0x2d   : > { %2436 = vmatprep.subr.bf16.mxu1 %v2843_v24 }
  0x2e   : > { %2405 = vmatmul.mubr.msk.bf16.gmra.mrb[12].mxu0 %vm400_vm0, %v2617_v25  ;;  %2421 = vmatmul.mubr.msk.bf16.gmra.mrb[12].mxu1 %vm400_vm0, %v2625_v26 }
  0x30   : > { %2437 = vmatpush3.bf16.msra.mxu1 %v2843_v24 }
  0x31   : > { %2438 = vmatprep.subr.bf16.mxu1 %v2855_v27 }
  0x34   : > { %2439 = vmatpush3.bf16.msra.mxu1 %v2855_v27 }
  0x35   : > { %2506 = vmatprep.subr.bf16.mxu1 %v2776_v5 }
  0xe9   : > { %v2866_v30 = vpop.f32.mrb[0].mxu0  ;;  %v2868_v31 = vpop.f32.mrb[0].mxu1 }
  0xea   : > { %v2870_v32 = vpop.f32.mrb[1].mxu0  ;;  %v2872_v33 = vpop.f32.mrb[1].mxu1 }
  0xeb   : > { %v2874_v34 = vpop.f32.mrb[2].mxu0  ;;  %v2876_v35 = vpop.f32.mrb[2].mxu1 }
  0xec   : > { %v630_v36 = vpack.c.bf16 %v2874_v34, %v2866_v30  ;;  %v2880_v37 = vpop.f32.mrb[3].mxu0  ;;  %v638_v38 = vpack.c.bf16 %v2876_v35, %v2868_v31  ;;  %v2884_v39 = vpop.f32.mrb[3].mxu1 }
  0xed   : > { %v629_v40 = vpack.c.bf16 %v2880_v37, %v2870_v32  ;;  %v637_v41 = vpack.c.bf16 %v2884_v39, %v2872_v33 }
  0xef   : > { %2440 = vmatprep.mubr.bf16.mxu1 %v629_v40 }
  0xf0   : > { %2441 = vmatmul.mubr.bf16.vlgmr.msra.gmra.mrb[16].mxu1 %v630_v36 }
  0xf1   : > { %v2890_v42 = vpop.f32.mrb[4].mxu0  ;;  %v2892_v43 = vpop.f32.mrb[4].mxu1  ;;  %2507 = vmatpush3.bf16.msra.mxu1 %v2776_v5 }
  0xf2   : > { %v2895_v44 = vpop.f32.mrb[5].mxu0  ;;  %v2897_v45 = vpop.f32.mrb[5].mxu1  ;;  %2508 = vmatprep.subr.bf16.mxu1 %v2784_v9 }
  0xf3   : > { %v2900_v46 = vpop.f32.mrb[6].mxu0  ;;  %v2902_v47 = vpop.f32.mrb[6].mxu1 }
  0xf4   : > { %v632_v48 = vpack.c.bf16 %v2900_v46, %v2890_v42  ;;  %v2906_v49 = vpop.f32.mrb[7].mxu0  ;;  %v640_v50 = vpack.c.bf16 %v2902_v47, %v2892_v43  ;;  %v2910_v51 = vpop.f32.mrb[7].mxu1 }
  0xf5   : > { %v631_v52 = vpack.c.bf16 %v2906_v49, %v2895_v44  ;;  %v639_v53 = vpack.c.bf16 %v2910_v51, %v2897_v45  ;;  %2509 = vmatpush3.bf16.msra.mxu1 %v2784_v9 }
  0xf6   : > { %2510 = vmatprep.subr.bf16.mxu1 %v2797_v12 }
  0xf7   : > { %2444 = vmatprep.mubr.bf16.mxu1 %v631_v52 }
  0xf8   : > { %2445 = vmatmul.mubr.bf16.gmra.mrb[20].mxu1 %v632_v48 }
  0xf9   : > { %v2918_v54 = vpop.f32.mrb[8].mxu0  ;;  %v2920_v55 = vpop.f32.mrb[8].mxu1  ;;  %2511 = vmatpush3.bf16.msra.mxu1 %v2797_v12 }
  0xfa   : > { %v2923_v56 = vpop.f32.mrb[9].mxu0  ;;  %v2925_v57 = vpop.f32.mrb[9].mxu1  ;;  %2512 = vmatprep.subr.bf16.mxu1 %v2810_v17 }
  0xfb   : > { %v2928_v58 = vpop.f32.mrb[10].mxu0  ;;  %v2930_v59 = vpop.f32.mrb[10].mxu1 }
  0xfc   : > { %v634_v60 = vpack.c.bf16 %v2928_v58, %v2918_v54  ;;  %v2934_v61 = vpop.f32.mrb[11].mxu0  ;;  %v642_v62 = vpack.c.bf16 %v2930_v59, %v2920_v55  ;;  %v2938_v63 = vpop.f32.mrb[11].mxu1 }
  0xfd   : > { %v633_v0 = vpack.c.bf16 %v2934_v61, %v2923_v56  ;;  %v641_v1 = vpack.c.bf16 %v2938_v63, %v2925_v57  ;;  %2513 = vmatpush3.bf16.msra.mxu1 %v2810_v17 }
  0xfe   : > { %2514 = vmatprep.subr.bf16.mxu1 %v2821_v18 }
  0xff   : > { %2448 = vmatprep.mubr.bf16.mxu1 %v633_v0 }
 0x100   : > { %2449 = vmatmul.mubr.bf16.gmra.mrb[24].mxu1 %v634_v60 }
 0x101   : > { %v2946_v2 = vpop.f32.mrb[12].mxu0  ;;  %v2948_v3 = vpop.f32.mrb[12].mxu1  ;;  %2515 = vmatpush3.bf16.msra.mxu1 %v2821_v18 }
 0x102   : > { %v2951_v4 = vpop.f32.mrb[13].mxu0  ;;  %v2953_v5 = vpop.f32.mrb[13].mxu1  ;;  %2516 = vmatprep.subr.bf16.mxu1 %v2832_v23 }
 0x103   : > { %v2956_v6 = vpop.f32.mrb[14].mxu0  ;;  %v2958_v7 = vpop.f32.mrb[14].mxu1 }
 0x104   : > { %v636_v8 = vpack.c.bf16 %v2956_v6, %v2946_v2  ;;  %v2962_v9 = vpop.f32.mrb[15].mxu0  ;;  %v644_v10 = vpack.c.bf16 %v2958_v7, %v2948_v3  ;;  %v2966_v11 = vpop.f32.mrb[15].mxu1 }
 0x105   : > { %v635_v12 = vpack.c.bf16 %v2962_v9, %v2951_v4  ;;  %v643_v13 = vpack.c.bf16 %v2966_v11, %v2953_v5  ;;  %2517 = vmatpush3.bf16.msra.mxu1 %v2832_v23 }
 0x106   : > { %2518 = vmatprep.subr.bf16.mxu1 %v2843_v24 }
 0x107   : > { %2452 = vmatprep.mubr.bf16.mxu1 %v635_v12 }
 0x108   : > { %2453 = vmatmul.mubr.bf16.gmra.mrb[28].mxu1 %v636_v8 }
 0x109   : > { %2456 = vmatprep.mubr.bf16.mxu1 %v637_v41  ;;  %2519 = vmatpush3.bf16.msra.mxu1 %v2843_v24 }
 0x10a   : > { %2520 = vmatprep.subr.bf16.mxu1 %v2855_v27 }
 0x10d   : > { %2521 = vmatpush3.bf16.msra.mxu1 %v2855_v27 }
 0x110   : > { %2457 = vmatmul.mubr.bf16.gmra.mrb[32].mxu1 %v638_v38 }
 0x111   : > { %2460 = vmatprep.mubr.bf16.mxu1 %v639_v53 }
 0x118   : > { %2461 = vmatmul.mubr.bf16.gmra.mrb[36].mxu1 %v640_v50 }
 0x119   : > { %2464 = vmatprep.mubr.bf16.mxu1 %v641_v1 }
 0x120   : > { %2465 = vmatmul.mubr.bf16.gmra.mrb[40].mxu1 %v642_v62 }
 0x121   : > { %2468 = vmatprep.mubr.bf16.mxu1 %v643_v13 }
 0x128   : > { %2469 = vmatmul.mubr.bf16.gmra.mrb[44].mxu1 %v644_v10 }
 0x1c3   : > { %v2442_v14 = vpop.f32.mrb[16].mxu1 }
 0x1c4   : > { %v727_v15 = vpop.f32.mrb[17].mxu1  ;;  %v856_v17 = vmul.f32 0.0625, %v2442_v14 }
 0x1c5   : > { %v2443_v16 = vpop.f32.mrb[18].mxu1  ;;  %v854_v20 = vmul.f32 0.0625, %v727_v15 }
 0x1c6   : > { %v857_v18 = vmul.f32 0.0625, %v2443_v16  ;;  %v730_v19 = vpop.f32.mrb[19].mxu1 }
 0x1c7   : > { %v855_v21 = vmul.f32 0.0625, %v730_v19 }
 0x1c8   : > { %v887_v22 = vpack.c.bf16 %v857_v18, %v856_v17 }
 0x1c9   : > { %v886_v23 = vpack.c.bf16 %v855_v21, %v854_v20 }
 0x1cb   : > { %v2446_v24 = vpop.f32.mrb[20].mxu1  ;;  %2474 = vmatprep.mubr.msk.bf16.mxu0 %vm902_vm2, %v886_v23 }
 0x1cc   : > { %v743_v25 = vpop.f32.mrb[21].mxu1  ;;  %2475 = vmatmul.mubr.msk.bf16.vlgmr.msra.gmra.mrb[16].mxu0 %vm902_vm2, %v887_v22  ;;  %v860_v27 = vmul.f32 0.0625, %v2446_v24 }
 0x1cd   : > { %v2447_v26 = vpop.f32.mrb[22].mxu1  ;;  %2555 = vmatpush3.bf16.msra.mxu0 %v2863_v29  ;;  %v858_v38 = vmul.f32 0.0625, %v743_v25 }
 0x1ce   : > { %v861_v28 = vmul.f32 0.0625, %v2447_v26  ;;  %v746_v36 = vpop.f32.mrb[23].mxu1 }
 0x1cf   : > { %v859_v40 = vmul.f32 0.0625, %v746_v36 }
 0x1d0   : > { %v889_v41 = vpack.c.bf16 %v861_v28, %v860_v27 }
 0x1d1   : > { %v888_v48 = vpack.c.bf16 %v859_v40, %v858_v38 }
 0x1d3   : > { %v2450_v50 = vpop.f32.mrb[24].mxu1  ;;  %2478 = vmatprep.mubr.msk.bf16.mxu0 %vm902_vm2, %v888_v48 }
 0x1d4   : > { %v759_v52 = vpop.f32.mrb[25].mxu1  ;;  %2479 = vmatmul.mubr.msk.bf16.gmra.mrb[20].mxu0 %vm902_vm2, %v889_v41  ;;  %v864_v60 = vmul.f32 0.0625, %v2450_v50 }
 0x1d5   : > { %v2451_v53 = vpop.f32.mrb[26].mxu1  ;;  %v862_v1 = vmul.f32 0.0625, %v759_v52 }
 0x1d6   : > { %v865_v62 = vmul.f32 0.0625, %v2451_v53  ;;  %v762_v0 = vpop.f32.mrb[27].mxu1 }
 0x1d7   : > { %v863_v8 = vmul.f32 0.0625, %v762_v0 }
 0x1d8   : > { %v891_v29 = vpack.c.bf16 %v865_v62, %v864_v60 }
 0x1d9   : > { %v890_v10 = vpack.c.bf16 %v863_v8, %v862_v1 }
 0x1db   : > { %v2454_v12 = vpop.f32.mrb[28].mxu1  ;;  %2482 = vmatprep.mubr.msk.bf16.mxu0 %vm902_vm2, %v890_v10 }
 0x1dc   : > { %v775_v13 = vpop.f32.mrb[29].mxu1  ;;  %2483 = vmatmul.mubr.msk.bf16.gmra.mrb[24].mxu0 %vm902_vm2, %v891_v29  ;;  %v868_v15 = vmul.f32 0.0625, %v2454_v12 }
 0x1dd   : > { %v2455_v14 = vpop.f32.mrb[30].mxu1  ;;  %v866_v18 = vmul.f32 0.0625, %v775_v13 }
 0x1de   : > { %v869_v16 = vmul.f32 0.0625, %v2455_v14  ;;  %v778_v17 = vpop.f32.mrb[31].mxu1 }
 0x1df   : > { %v867_v19 = vmul.f32 0.0625, %v778_v17 }
 0x1e0   : > { %v893_v20 = vpack.c.bf16 %v869_v16, %v868_v15 }
 0x1e1   : > { %v892_v21 = vpack.c.bf16 %v867_v19, %v866_v18 }
 0x1e3   : > { %v2458_v22 = vpop.f32.mrb[32].mxu1  ;;  %2486 = vmatprep.mubr.msk.bf16.mxu0 %vm902_vm2, %v892_v21 }
 0x1e4   : > { %v791_v23 = vpop.f32.mrb[33].mxu1  ;;  %2487 = vmatmul.mubr.msk.bf16.gmra.mrb[28].mxu0 %vm902_vm2, %v893_v20  ;;  %v872_v25 = vmul.f32 0.0625, %v2458_v22 }
 0x1e5   : > { %v2459_v24 = vpop.f32.mrb[34].mxu1  ;;  %v870_v28 = vmul.f32 0.0625, %v791_v23 }
 0x1e6   : > { %v873_v26 = vmul.f32 0.0625, %v2459_v24  ;;  %v794_v27 = vpop.f32.mrb[35].mxu1 }
 0x1e7   : > { %v871_v36 = vmul.f32 0.0625, %v794_v27 }
 0x1e8   : > { %v895_v38 = vpack.c.bf16 %v873_v26, %v872_v25 }
 0x1e9   : > { %v894_v40 = vpack.c.bf16 %v871_v36, %v870_v28 }
 0x1eb   : > { %v2462_v41 = vpop.f32.mrb[36].mxu1  ;;  %2490 = vmatprep.mubr.msk.bf16.mxu0 %vm902_vm2, %v894_v40 }
 0x1ec   : > { %v807_v48 = vpop.f32.mrb[37].mxu1  ;;  %2491 = vmatmul.mubr.msk.bf16.gmra.mrb[32].mxu0 %vm902_vm2, %v895_v38  ;;  %v876_v52 = vmul.f32 0.0625, %v2462_v41 }
 0x1ed   : > { %v2463_v50 = vpop.f32.mrb[38].mxu1  ;;  %v874_v62 = vmul.f32 0.0625, %v807_v48 }
 0x1ee   : > { %v877_v53 = vmul.f32 0.0625, %v2463_v50  ;;  %v810_v60 = vpop.f32.mrb[39].mxu1 }
 0x1ef   : > { %v875_v0 = vmul.f32 0.0625, %v810_v60 }
 0x1f0   : > { %v897_v1 = vpack.c.bf16 %v877_v53, %v876_v52 }
 0x1f1   : > { %v896_v8 = vpack.c.bf16 %v875_v0, %v874_v62 }
 0x1f3   : > { %v2466_v29 = vpop.f32.mrb[40].mxu1  ;;  %2494 = vmatprep.mubr.msk.bf16.mxu0 %vm902_vm2, %v896_v8 }
 0x1f4   : > { %v823_v10 = vpop.f32.mrb[41].mxu1  ;;  %2495 = vmatmul.mubr.msk.bf16.gmra.mrb[36].mxu0 %vm902_vm2, %v897_v1  ;;  %v880_v13 = vmul.f32 0.0625, %v2466_v29 }
 0x1f5   : > { %v2467_v12 = vpop.f32.mrb[42].mxu1  ;;  %v878_v16 = vmul.f32 0.0625, %v823_v10 }
 0x1f6   : > { %v881_v14 = vmul.f32 0.0625, %v2467_v12  ;;  %v826_v15 = vpop.f32.mrb[43].mxu1 }
 0x1f7   : > { %v879_v17 = vmul.f32 0.0625, %v826_v15 }
 0x1f8   : > { %v899_v18 = vpack.c.bf16 %v881_v14, %v880_v13 }
 0x1f9   : > { %v898_v19 = vpack.c.bf16 %v879_v17, %v878_v16 }
 0x1fb   : > { %v2470_v20 = vpop.f32.mrb[44].mxu1  ;;  %2498 = vmatprep.mubr.msk.bf16.mxu0 %vm902_vm2, %v898_v19 }
 0x1fc   : > { %v839_v21 = vpop.f32.mrb[45].mxu1  ;;  %2499 = vmatmul.mubr.msk.bf16.gmra.mrb[40].mxu0 %vm902_vm2, %v899_v18  ;;  %v884_v23 = vmul.f32 0.0625, %v2470_v20 }
 0x1fd   : > { %v2471_v22 = vpop.f32.mrb[46].mxu1  ;;  %v882_v26 = vmul.f32 0.0625, %v839_v21 }
 0x1fe   : > { %v885_v24 = vmul.f32 0.0625, %v2471_v22  ;;  %v842_v25 = vpop.f32.mrb[47].mxu1 }
 0x1ff   : > { %v883_v27 = vmul.f32 0.0625, %v842_v25 }
 0x200   : > { %v901_v28 = vpack.c.bf16 %v885_v24, %v884_v23 }
 0x201   : > { %v900_v36 = vpack.c.bf16 %v883_v27, %v882_v26 }
 0x203   : > { %2502 = vmatprep.mubr.msk.bf16.mxu0 %vm902_vm2, %v900_v36 }
 0x204   : > { %2503 = vmatmul.mubr.msk.bf16.gmra.mrb[44].mxu0 %vm902_vm2, %v901_v28 }
 0x29f   : > { %v2476_v38 = vpop.f32.mrb[16].mxu0 }
 0x2a0   : > { %v2998_v40 = vsub.f32 %v2866_v30, %v2476_v38  ;;  %v989_v41 = vpop.f32.mrb[17].mxu0 }
 0x2a1   : > { %v3001_v48 = vsub.f32 %v2870_v32, %v989_v41  ;;  %v2477_v50 = vpop.f32.mrb[18].mxu0 }
 0x2a2   : > { %v3004_v52 = vsub.f32 %v2874_v34, %v2477_v50  ;;  %v992_v53 = vpop.f32.mrb[19].mxu0  ;;  %v1150_v32 = vmul.f32 %v2998_v40, %v2998_v40 }
 0x2a3   : > { %v3007_v60 = vsub.f32 %v2880_v37, %v992_v53  ;;  %v1148_v0 = vmul.f32 %v3001_v48, %v3001_v48 }
 0x2a4   : > { %v1151_v62 = vmul.f32 %v3004_v52, %v3004_v52 }
 0x2a5   : > { %v1149_v30 = vmul.f32 %v3007_v60, %v3007_v60 }
 0x2a6   : > { %v1181_v34 = vpack.c.bf16 %v1151_v62, %v1150_v32 }
 0x2a7   : > { %v2480_v1 = vpop.f32.mrb[20].mxu0  ;;  %v1180_v8 = vpack.c.bf16 %v1149_v30, %v1148_v0 }
 0x2a8   : > { %v3018_v29 = vsub.f32 %v2890_v42, %v2480_v1  ;;  %v1005_v37 = vpop.f32.mrb[21].mxu0 }
 0x2a9   : > { %v3021_v10 = vsub.f32 %v2895_v44, %v1005_v37  ;;  %v2481_v12 = vpop.f32.mrb[22].mxu0  ;;  %2522 = vmatprep.mubr.bf16.mxu1 %v1180_v8 }
 0x2aa   : > { %v3024_v13 = vsub.f32 %v2900_v46, %v2481_v12  ;;  %v1008_v14 = vpop.f32.mrb[23].mxu0  ;;  %2523 = vmatmul.mubr.bf16.vlgmr.msra.gmra.mrb[48].mxu1 %v1181_v34  ;;  %v1154_v17 = vmul.f32 %v3018_v29, %v3018_v29 }
 0x2ab   : > { %v3027_v15 = vsub.f32 %v2906_v49, %v1008_v14  ;;  %v1152_v42 = vmul.f32 %v3021_v10, %v3021_v10 }
 0x2ac   : > { %v1155_v16 = vmul.f32 %v3024_v13, %v3024_v13 }
 0x2ad   : > { %v1153_v44 = vmul.f32 %v3027_v15, %v3027_v15 }
 0x2ae   : > { %v1183_v49 = vpack.c.bf16 %v1155_v16, %v1154_v17 }
 0x2af   : > { %v2484_v18 = vpop.f32.mrb[24].mxu0  ;;  %v1182_v46 = vpack.c.bf16 %v1153_v44, %v1152_v42 }
 0x2b0   : > { %v3038_v19 = vsub.f32 %v2918_v54, %v2484_v18  ;;  %v1021_v20 = vpop.f32.mrb[25].mxu0 }
 0x2b1   : > { %v3041_v21 = vsub.f32 %v2923_v56, %v1021_v20  ;;  %v2485_v22 = vpop.f32.mrb[26].mxu0  ;;  %2526 = vmatprep.mubr.bf16.mxu1 %v1182_v46 }
 0x2b2   : > { %v3044_v23 = vsub.f32 %v2928_v58, %v2485_v22  ;;  %v1024_v24 = vpop.f32.mrb[27].mxu0  ;;  %2527 = vmatmul.mubr.bf16.gmra.mrb[52].mxu1 %v1183_v49  ;;  %v1158_v27 = vmul.f32 %v3038_v19, %v3038_v19 }
 0x2b3   : > { %v3047_v25 = vsub.f32 %v2934_v61, %v1024_v24  ;;  %v1156_v54 = vmul.f32 %v3041_v21, %v3041_v21 }
 0x2b4   : > { %v1159_v26 = vmul.f32 %v3044_v23, %v3044_v23 }
 0x2b5   : > { %v1157_v56 = vmul.f32 %v3047_v25, %v3047_v25 }
 0x2b6   : > { %v1185_v61 = vpack.c.bf16 %v1159_v26, %v1158_v27 }
 0x2b7   : > { %v2488_v28 = vpop.f32.mrb[28].mxu0  ;;  %v1184_v58 = vpack.c.bf16 %v1157_v56, %v1156_v54 }
 0x2b8   : > { %v3058_v36 = vsub.f32 %v2946_v2, %v2488_v28  ;;  %v1037_v38 = vpop.f32.mrb[29].mxu0 }
 0x2b9   : > { %v3061_v41 = vsub.f32 %v2951_v4, %v1037_v38  ;;  %v2489_v50 = vpop.f32.mrb[30].mxu0  ;;  %2530 = vmatprep.mubr.bf16.mxu1 %v1184_v58 }
 0x2ba   : > { %v3064_v53 = vsub.f32 %v2956_v6, %v2489_v50  ;;  %v1040_v62 = vpop.f32.mrb[31].mxu0  ;;  %2531 = vmatmul.mubr.bf16.gmra.mrb[56].mxu1 %v1185_v61  ;;  %v1162_v32 = vmul.f32 %v3058_v36, %v3058_v36 }
 0x2bb   : > { %v3067_v0 = vsub.f32 %v2962_v9, %v1040_v62  ;;  %v1160_v2 = vmul.f32 %v3061_v41, %v3061_v41 }
 0x2bc   : > { %v1163_v30 = vmul.f32 %v3064_v53, %v3064_v53 }
 0x2bd   : > { %v1161_v4 = vmul.f32 %v3067_v0, %v3067_v0 }
 0x2be   : > { %v1187_v9 = vpack.c.bf16 %v1163_v30, %v1162_v32 }
 0x2bf   : > { %v2492_v1 = vpop.f32.mrb[32].mxu0  ;;  %v1186_v6 = vpack.c.bf16 %v1161_v4, %v1160_v2 }
 0x2c0   : > { %v3078_v8 = vsub.f32 %v2868_v31, %v2492_v1  ;;  %v1053_v34 = vpop.f32.mrb[33].mxu0 }
 0x2c1   : > { %v3081_v37 = vsub.f32 %v2872_v33, %v1053_v34  ;;  %v2493_v12 = vpop.f32.mrb[34].mxu0  ;;  %2534 = vmatprep.mubr.bf16.mxu1 %v1186_v6 }
 0x2c2   : > { %v3084_v14 = vsub.f32 %v2876_v35, %v2493_v12  ;;  %v1056_v16 = vpop.f32.mrb[35].mxu0  ;;  %2535 = vmatmul.mubr.bf16.gmra.mrb[60].mxu1 %v1187_v9  ;;  %v1166_v17 = vmul.f32 %v3078_v8, %v3078_v8 }
 0x2c3   : > { %v3087_v42 = vsub.f32 %v2884_v39, %v1056_v16  ;;  %v1164_v31 = vmul.f32 %v3081_v37, %v3081_v37 }
 0x2c4   : > { %v1167_v44 = vmul.f32 %v3084_v14, %v3084_v14 }
 0x2c5   : > { %v1165_v33 = vmul.f32 %v3087_v42, %v3087_v42 }
 0x2c6   : > { %v1189_v39 = vpack.c.bf16 %v1167_v44, %v1166_v17 }
 0x2c7   : > { %v2496_v18 = vpop.f32.mrb[36].mxu0  ;;  %v1188_v35 = vpack.c.bf16 %v1165_v33, %v1164_v31 }
 0x2c8   : > { %v3098_v46 = vsub.f32 %v2892_v43, %v2496_v18  ;;  %v1069_v20 = vpop.f32.mrb[37].mxu0 }
 0x2c9   : > { %v3101_v49 = vsub.f32 %v2897_v45, %v1069_v20  ;;  %v2497_v22 = vpop.f32.mrb[38].mxu0  ;;  %2538 = vmatprep.mubr.bf16.mxu1 %v1188_v35 }
 0x2ca   : > { %v3104_v24 = vsub.f32 %v2902_v47, %v2497_v22  ;;  %v1072_v26 = vpop.f32.mrb[39].mxu0  ;;  %2539 = vmatmul.mubr.bf16.gmra.mrb[64].mxu1 %v1189_v39  ;;  %v1170_v27 = vmul.f32 %v3098_v46, %v3098_v46 }
 0x2cb   : > { %v3107_v54 = vsub.f32 %v2910_v51, %v1072_v26  ;;  %v1168_v43 = vmul.f32 %v3101_v49, %v3101_v49 }
 0x2cc   : > { %v1171_v56 = vmul.f32 %v3104_v24, %v3104_v24 }
 0x2cd   : > { %v1169_v45 = vmul.f32 %v3107_v54, %v3107_v54 }
 0x2ce   : > { %v1191_v51 = vpack.c.bf16 %v1171_v56, %v1170_v27 }
 0x2cf   : > { %v2500_v28 = vpop.f32.mrb[40].mxu0  ;;  %v1190_v47 = vpack.c.bf16 %v1169_v45, %v1168_v43 }
 0x2d0   : > { %v3118_v58 = vsub.f32 %v2920_v55, %v2500_v28  ;;  %v1085_v38 = vpop.f32.mrb[41].mxu0 }
 0x2d1   : > { %v3121_v61 = vsub.f32 %v2925_v57, %v1085_v38  ;;  %v2501_v50 = vpop.f32.mrb[42].mxu0  ;;  %2542 = vmatprep.mubr.bf16.mxu1 %v1190_v47 }
 0x2d2   : > { %v3124_v62 = vsub.f32 %v2930_v59, %v2501_v50  ;;  %v1088_v30 = vpop.f32.mrb[43].mxu0  ;;  %2543 = vmatmul.mubr.bf16.gmra.mrb[68].mxu1 %v1191_v51  ;;  %v1174_v32 = vmul.f32 %v3118_v58, %v3118_v58 }
 0x2d3   : > { %v3127_v2 = vsub.f32 %v2938_v63, %v1088_v30  ;;  %v1172_v55 = vmul.f32 %v3121_v61, %v3121_v61 }
 0x2d4   : > { %v1175_v4 = vmul.f32 %v3124_v62, %v3124_v62 }
 0x2d5   : > { %v1173_v57 = vmul.f32 %v3127_v2, %v3127_v2 }
 0x2d6   : > { %v1193_v63 = vpack.c.bf16 %v1175_v4, %v1174_v32 }
 0x2d7   : > { %v2504_v1 = vpop.f32.mrb[44].mxu0  ;;  %v1192_v59 = vpack.c.bf16 %v1173_v57, %v1172_v55 }
 0x2d8   : > { %v3138_v6 = vsub.f32 %v2948_v3, %v2504_v1  ;;  %v1101_v34 = vpop.f32.mrb[45].mxu0 }
 0x2d9   : > { %v3141_v9 = vsub.f32 %v2953_v5, %v1101_v34  ;;  %v2505_v12 = vpop.f32.mrb[46].mxu0  ;;  %2546 = vmatprep.mubr.bf16.mxu1 %v1192_v59 }
 0x2da   : > { %v3144_v16 = vsub.f32 %v2958_v7, %v2505_v12  ;;  %v1104_v44 = vpop.f32.mrb[47].mxu0  ;;  %2547 = vmatmul.mubr.bf16.gmra.mrb[72].mxu1 %v1193_v63  ;;  %v1178_v17 = vmul.f32 %v3138_v6, %v3138_v6 }
 0x2db   : > { %v3147_v31 = vsub.f32 %v2966_v11, %v1104_v44  ;;  %v1176_v3 = vmul.f32 %v3141_v9, %v3141_v9 }
 0x2dc   : > { %v1179_v33 = vmul.f32 %v3144_v16, %v3144_v16 }
 0x2dd   : > { %v1177_v5 = vmul.f32 %v3147_v31, %v3147_v31 }
 0x2de   : > { %v1195_v7 = vpack.c.bf16 %v1179_v33, %v1178_v17 }
 0x2df   : > { %v1194_v18 = vpack.c.bf16 %v1177_v5, %v1176_v3 }
 0x2e1   : > { %2550 = vmatprep.mubr.bf16.mxu1 %v1194_v18 }
 0x2e2   : > { %2551 = vmatmul.mubr.bf16.gmra.mrb[76].mxu1 %v1195_v7 }
 0x37d   : > { %v2524_v35 = vpop.f32.mrb[48].mxu1 }
 0x37e   : > { %v1230_v20 = vpop.f32.mrb[49].mxu1  ;;  %v1359_v39 = vmul.f32 0.0625, %v2524_v35 }
 0x37f   : > { %v2525_v11 = vpop.f32.mrb[50].mxu1  ;;  %v1357_v56 = vmul.f32 0.0625, %v1230_v20 }
 0x380   : > { %v1360_v22 = vmul.f32 0.0625, %v2525_v11  ;;  %v1233_v26 = vpop.f32.mrb[51].mxu1 }
 0x381   : > { %v1358_v43 = vmul.f32 0.0625, %v1233_v26 }
 0x382   : > { %v1390_v45 = vpack.c.bf16 %v1360_v22, %v1359_v39 }
 0x383   : > { %v1389_v27 = vpack.c.bf16 %v1358_v43, %v1357_v56 }
 0x385   : > { %v2528_v28 = vpop.f32.mrb[52].mxu1  ;;  %2556 = vmatprep.mubr.msk.bf16.mxu0 %vm902_vm2, %v1389_v27 }
 0x386   : > { %v1246_v47 = vpop.f32.mrb[53].mxu1  ;;  %2557 = vmatmul.mubr.msk.bf16.vlgmr.msra.gmra.mrb[48].mxu0 %vm902_vm2, %v1390_v45  ;;  %v1363_v51 = vmul.f32 0.0625, %v2528_v28 }
 0x387   : > { %v2529_v38 = vpop.f32.mrb[54].mxu1  ;;  %v1361_v4 = vmul.f32 0.0625, %v1246_v47 }
 0x388   : > { %v1364_v50 = vmul.f32 0.0625, %v2529_v38  ;;  %v1249_v30 = vpop.f32.mrb[55].mxu1 }
 0x389   : > { %v1362_v55 = vmul.f32 0.0625, %v1249_v30 }
 0x38a   : > { %v1392_v57 = vpack.c.bf16 %v1364_v50, %v1363_v51 }
 0x38b   : > { %v1391_v32 = vpack.c.bf16 %v1362_v55, %v1361_v4 }
 0x38d   : > { %v2532_v1 = vpop.f32.mrb[56].mxu1  ;;  %2560 = vmatprep.mubr.msk.bf16.mxu0 %vm902_vm2, %v1391_v32 }
 0x38e   : > { %v1262_v59 = vpop.f32.mrb[57].mxu1  ;;  %2561 = vmatmul.mubr.msk.bf16.gmra.mrb[52].mxu0 %vm902_vm2, %v1392_v57  ;;  %v1367_v63 = vmul.f32 0.0625, %v2532_v1 }
 0x38f   : > { %v2533_v34 = vpop.f32.mrb[58].mxu1  ;;  %v1365_v33 = vmul.f32 0.0625, %v1262_v59 }
 0x390   : > { %v1368_v12 = vmul.f32 0.0625, %v2533_v34  ;;  %v1265_v44 = vpop.f32.mrb[59].mxu1 }
 0x391   : > { %v1366_v3 = vmul.f32 0.0625, %v1265_v44 }
 0x392   : > { %v1394_v5 = vpack.c.bf16 %v1368_v12, %v1367_v63 }
 0x393   : > { %v1393_v17 = vpack.c.bf16 %v1366_v3, %v1365_v33 }
 0x395   : > { %v2536_v18 = vpop.f32.mrb[60].mxu1  ;;  %2564 = vmatprep.mubr.msk.bf16.mxu0 %vm902_vm2, %v1393_v17 }
 0x396   : > { %v1278_v7 = vpop.f32.mrb[61].mxu1  ;;  %2565 = vmatmul.mubr.msk.bf16.gmra.mrb[56].mxu0 %vm902_vm2, %v1394_v5  ;;  %v1371_v20 = vmul.f32 0.0625, %v2536_v18 }
 0x397   : > { %v2537_v35 = vpop.f32.mrb[62].mxu1  ;;  %v1369_v22 = vmul.f32 0.0625, %v1278_v7 }
 0x398   : > { %v1372_v11 = vmul.f32 0.0625, %v2537_v35  ;;  %v1281_v39 = vpop.f32.mrb[63].mxu1 }
 0x399   : > { %v1370_v26 = vmul.f32 0.0625, %v1281_v39 }
 0x39a   : > { %v1396_v56 = vpack.c.bf16 %v1372_v11, %v1371_v20 }
 0x39b   : > { %v1395_v43 = vpack.c.bf16 %v1370_v26, %v1369_v22 }
 0x39d   : > { %v2540_v45 = vpop.f32.mrb[64].mxu1  ;;  %2568 = vmatprep.mubr.msk.bf16.mxu0 %vm902_vm2, %v1395_v43 }
 0x39e   : > { %v1294_v27 = vpop.f32.mrb[65].mxu1  ;;  %2569 = vmatmul.mubr.msk.bf16.gmra.mrb[60].mxu0 %vm902_vm2, %v1396_v56  ;;  %v1375_v47 = vmul.f32 0.0625, %v2540_v45 }
 0x39f   : > { %v2541_v28 = vpop.f32.mrb[66].mxu1  ;;  %v1373_v50 = vmul.f32 0.0625, %v1294_v27 }
 0x3a0   : > { %v1376_v38 = vmul.f32 0.0625, %v2541_v28  ;;  %v1297_v51 = vpop.f32.mrb[67].mxu1 }
 0x3a1   : > { %v1374_v30 = vmul.f32 0.0625, %v1297_v51 }
 0x3a2   : > { %v1398_v4 = vpack.c.bf16 %v1376_v38, %v1375_v47 }
 0x3a3   : > { %v1397_v55 = vpack.c.bf16 %v1374_v30, %v1373_v50 }
 0x3a5   : > { %v2544_v57 = vpop.f32.mrb[68].mxu1  ;;  %2572 = vmatprep.mubr.msk.bf16.mxu0 %vm902_vm2, %v1397_v55 }
 0x3a6   : > { %v1310_v32 = vpop.f32.mrb[69].mxu1  ;;  %2573 = vmatmul.mubr.msk.bf16.gmra.mrb[64].mxu0 %vm902_vm2, %v1398_v4  ;;  %v1379_v59 = vmul.f32 0.0625, %v2544_v57 }
 0x3a7   : > { %v2545_v1 = vpop.f32.mrb[70].mxu1  ;;  %v1377_v12 = vmul.f32 0.0625, %v1310_v32 }
 0x3a8   : > { %v1380_v34 = vmul.f32 0.0625, %v2545_v1  ;;  %v1313_v63 = vpop.f32.mrb[71].mxu1 }
 0x3a9   : > { %v1378_v44 = vmul.f32 0.0625, %v1313_v63 }
 0x3aa   : > { %v1400_v33 = vpack.c.bf16 %v1380_v34, %v1379_v59 }
 0x3ab   : > { %v1399_v3 = vpack.c.bf16 %v1378_v44, %v1377_v12 }
 0x3ad   : > { %v2548_v5 = vpop.f32.mrb[72].mxu1  ;;  %2576 = vmatprep.mubr.msk.bf16.mxu0 %vm902_vm2, %v1399_v3 }
 0x3ae   : > { %v1326_v17 = vpop.f32.mrb[73].mxu1  ;;  %2577 = vmatmul.mubr.msk.bf16.gmra.mrb[68].mxu0 %vm902_vm2, %v1400_v33  ;;  %v1383_v7 = vmul.f32 0.0625, %v2548_v5 }
 0x3af   : > { %v2549_v18 = vpop.f32.mrb[74].mxu1  ;;  %v1381_v11 = vmul.f32 0.0625, %v1326_v17 }
 0x3b0   : > { %v1384_v35 = vmul.f32 0.0625, %v2549_v18  ;;  %v1329_v20 = vpop.f32.mrb[75].mxu1 }
 0x3b1   : > { %v1382_v39 = vmul.f32 0.0625, %v1329_v20 }
 0x3b2   : > { %v1402_v22 = vpack.c.bf16 %v1384_v35, %v1383_v7 }
 0x3b3   : > { %v1401_v26 = vpack.c.bf16 %v1382_v39, %v1381_v11 }
 0x3b5   : > { %v2552_v56 = vpop.f32.mrb[76].mxu1  ;;  %2580 = vmatprep.mubr.msk.bf16.mxu0 %vm902_vm2, %v1401_v26 }
 0x3b6   : > { %v1342_v43 = vpop.f32.mrb[77].mxu1  ;;  %2581 = vmatmul.mubr.msk.bf16.gmra.mrb[72].mxu0 %vm902_vm2, %v1402_v22  ;;  %v1387_v27 = vmul.f32 0.0625, %v2552_v56 }
 0x3b7   : > { %v2553_v45 = vpop.f32.mrb[78].mxu1  ;;  %v1385_v38 = vmul.f32 0.0625, %v1342_v43 }
 0x3b8   : > { %v1388_v28 = vmul.f32 0.0625, %v2553_v45  ;;  %v1345_v47 = vpop.f32.mrb[79].mxu1 }
 0x3b9   : > { %v1386_v51 = vmul.f32 0.0625, %v1345_v47 }
 0x3ba   : > { %v1404_v50 = vpack.c.bf16 %v1388_v28, %v1387_v27  ;;  %v3176_v27 = vld [vmem:[%s3309_s4] ss:$0 sm:$0xff] }
 0x3bb   : > { %v1403_v30 = vpack.c.bf16 %v1386_v51, %v1385_v38 }
 0x3bd   : > { %2584 = vmatprep.mubr.msk.bf16.mxu0 %vm902_vm2, %v1403_v30 }
 0x3be   : > { %2585 = vmatmul.mubr.msk.bf16.gmra.mrb[76].mxu0 %vm902_vm2, %v1404_v50 }
 0x459   : > { %v2558_v4 = vpop.f32.mrb[48].mxu0 }
 0x45a   : > { %v1616_v55 = vmax.f32 %v2558_v4, 0.0  ;;  %v1487_v57 = vpop.f32.mrb[49].mxu0 }
 0x45b   : > { %v1614_v32 = vmax.f32 %v1487_v57, 0.0  ;;  %v2559_v1 = vpop.f32.mrb[50].mxu0 }
 0x45c   : > { %v1648_v59 = vadd.f32 1e-05, %v1616_v55  ;;  %v1617_v34 = vmax.f32 %v2559_v1, 0.0  ;;  %v1490_v63 = vpop.f32.mrb[51].mxu0 }
 0x45d   : > { %v1646_v12 = vadd.f32 1e-05, %v1614_v32  ;;  %v1615_v44 = vmax.f32 %v1490_v63, 0.0 }
 0x45e   : > { %2634 = vrsqrt.f32 %v1648_v59  ;;  %v1649_v33 = vadd.f32 1e-05, %v1617_v34  ;;  %v3185_v34 = vld [vmem:[%s3310_s5] ss:$0 sm:$0xff] }
 0x45f   : > { %2636 = vrsqrt.f32 %v1646_v12  ;;  %v1647_v3 = vadd.f32 1e-05, %v1615_v44 }
 0x460   : > { %2638 = vrsqrt.f32 %v1649_v33 }
 0x461   : > { %2640 = vrsqrt.f32 %v1647_v3  ;;  %v2562_v5 = vpop.f32.mrb[52].mxu0 }
 0x462   : > { %v1620_v17 = vmax.f32 %v2562_v5, 0.0  ;;  %v1503_v18 = vpop.f32.mrb[53].mxu0 }
 0x463   : > { %v1618_v7 = vmax.f32 %v1503_v18, 0.0  ;;  %v2563_v35 = vpop.f32.mrb[54].mxu0 }
 0x464   : > { %v1652_v20 = vadd.f32 1e-05, %v1620_v17  ;;  %v1621_v11 = vmax.f32 %v2563_v35, 0.0  ;;  %v1506_v39 = vpop.f32.mrb[55].mxu0 }
 0x465   : > { %v1650_v22 = vadd.f32 1e-05, %v1618_v7  ;;  %v1619_v26 = vmax.f32 %v1506_v39, 0.0 }
 0x466   : > { %2642 = vrsqrt.f32 %v1652_v20  ;;  %v1653_v56 = vadd.f32 1e-05, %v1621_v11 }
 0x467   : > { %2644 = vrsqrt.f32 %v1650_v22  ;;  %v1651_v43 = vadd.f32 1e-05, %v1619_v26 }
 0x468   : > { %v2635_v45 = vpop.eup %2634  ;;  %2646 = vrsqrt.f32 %v1653_v56 }
 0x469   : > { %v2637_v28 = vpop.eup %2636  ;;  %v1712_v47 = vmul.f32 %v2635_v45, %v2998_v40  ;;  %2648 = vrsqrt.f32 %v1651_v43  ;;  %v2566_v38 = vpop.f32.mrb[56].mxu0 }
 0x46a   : > { %v2639_v51 = vpop.eup %2638  ;;  %v1710_v50 = vmul.f32 %v2637_v28, %v3001_v48  ;;  %v1624_v30 = vmax.f32 %v2566_v38, 0.0  ;;  %v1519_v4 = vpop.f32.mrb[57].mxu0 }
 0x46b   : > { %v2641_v55 = vpop.eup %2640  ;;  %v1750_v57 = vmul.f32 %v3176_v27, %v1712_v47  ;;  %v1713_v32 = vmul.f32 %v2639_v51, %v3004_v52  ;;  %v1622_v1 = vmax.f32 %v1519_v4, 0.0  ;;  %v2567_v59 = vpop.f32.mrb[58].mxu0 }
 0x46c   : > { %v1748_v40 = vmul.f32 %v3176_v27, %v1710_v50  ;;  %v1711_v63 = vmul.f32 %v2641_v55, %v3007_v60  ;;  %v1656_v48 = vadd.f32 1e-05, %v1624_v30  ;;  %v1625_v12 = vmax.f32 %v2567_v59, 0.0  ;;  %v1522_v44 = vpop.f32.mrb[59].mxu0 }
 0x46d   : > { %v1751_v33 = vmul.f32 %v3176_v27, %v1713_v32  ;;  %v1654_v3 = vadd.f32 1e-05, %v1622_v1  ;;  %v1623_v5 = vmax.f32 %v1522_v44, 0.0  ;;  %v1788_v18 = vadd.f32 %v3185_v34, %v1750_v57 }
 0x46e   : > { %v1749_v52 = vmul.f32 %v3176_v27, %v1711_v63  ;;  %2650 = vrsqrt.f32 %v1656_v48  ;;  %v1657_v17 = vadd.f32 1e-05, %v1625_v12  ;;  %v1786_v60 = vadd.f32 %v3185_v34, %v1748_v40 }
 0x46f   : > { %v1789_v7 = vadd.f32 %v3185_v34, %v1751_v33  ;;  %2652 = vrsqrt.f32 %v1654_v3  ;;  %v1655_v35 = vadd.f32 1e-05, %v1623_v5 }
 0x470   : > { %v2643_v20 = vpop.eup %2642  ;;  %v1787_v11 = vadd.f32 %v3185_v34, %v1749_v52  ;;  %2654 = vrsqrt.f32 %v1657_v17 }
 0x471   : > { %v2645_v39 = vpop.eup %2644  ;;  %v2195_v22 = vpack.c.bf16 %v1789_v7, %v1788_v18  ;;  %v1716_v26 = vmul.f32 %v2643_v20, %v3018_v29  ;;  %2656 = vrsqrt.f32 %v1655_v35  ;;  %v2570_v56 = vpop.f32.mrb[60].mxu0 }
 0x472   : > { %v2647_v43 = vpop.eup %2646  ;;  %v2190_v45 = vpack.c.bf16 %v1787_v11, %v1786_v60  ;;  %v1714_v28 = vmul.f32 %v2645_v39, %v3021_v10  ;;  %v1628_v47 = vmax.f32 %v2570_v56, 0.0  ;;  %v1535_v38 = vpop.f32.mrb[61].mxu0 }
 0x473   : > { %v2649_v51 = vpop.eup %2648  ;;  %2267 = vst [vmem:[%s3199_s15 + $0x8] sm:$0xff] %v2195_v22   ;;  %v1754_v50 = vmul.f32 %v3176_v27, %v1716_v26  ;;  %v1717_v30 = vmul.f32 %v2647_v43, %v3024_v13  ;;  %v1626_v4 = vmax.f32 %v1535_v38, 0.0  ;;  %v2571_v55 = vpop.f32.mrb[62].mxu0 }
 0x474   : > { %2191 = vst [vmem:[%s3199_s15] sm:$0xff] %v2190_v45   ;;  %v1752_v57 = vmul.f32 %v3176_v27, %v1714_v28  ;;  %v1715_v29 = vmul.f32 %v2649_v51, %v3027_v15  ;;  %v1660_v32 = vadd.f32 1e-05, %v1628_v47  ;;  %v1629_v1 = vmax.f32 %v2571_v55, 0.0  ;;  %v1538_v59 = vpop.f32.mrb[63].mxu0 }
 0x475   : > { %v1755_v10 = vmul.f32 %v3176_v27, %v1717_v30  ;;  %v1658_v40 = vadd.f32 1e-05, %v1626_v4  ;;  %v1627_v63 = vmax.f32 %v1538_v59, 0.0  ;;  %v1792_v13 = vadd.f32 %v3185_v34, %v1754_v50 }
 0x476   : > { %v1753_v48 = vmul.f32 %v3176_v27, %v1715_v29  ;;  %2658 = vrsqrt.f32 %v1660_v32  ;;  %v1661_v12 = vadd.f32 1e-05, %v1629_v1  ;;  %v1790_v15 = vadd.f32 %v3185_v34, %v1752_v57 }
 0x477   : > { %v1793_v44 = vadd.f32 %v3185_v34, %v1755_v10  ;;  %2660 = vrsqrt.f32 %v1658_v40  ;;  %v1659_v33 = vadd.f32 1e-05, %v1627_v63 }
 0x478   : > { %v2651_v3 = vpop.eup %2650  ;;  %v1791_v5 = vadd.f32 %v3185_v34, %v1753_v48  ;;  %2662 = vrsqrt.f32 %v1661_v12 }
 0x479   : > { %v2653_v52 = vpop.eup %2652  ;;  %v2205_v17 = vpack.c.bf16 %v1793_v44, %v1792_v13  ;;  %v1720_v18 = vmul.f32 %v2651_v3, %v3038_v19  ;;  %2664 = vrsqrt.f32 %v1659_v33  ;;  %v2574_v7 = vpop.f32.mrb[64].mxu0 }
 0x47a   : > { %v2655_v35 = vpop.eup %2654  ;;  %v2200_v20 = vpack.c.bf16 %v1791_v5, %v1790_v15  ;;  %v1718_v60 = vmul.f32 %v2653_v52, %v3041_v21  ;;  %v1632_v11 = vmax.f32 %v2574_v7, 0.0  ;;  %v1551_v39 = vpop.f32.mrb[65].mxu0 }
 0x47b   : > { %v2657_v22 = vpop.eup %2656  ;;  %2269 = vst [vmem:[%s3199_s15 + $0x18] sm:$0xff] %v2205_v17   ;;  %v1758_v26 = vmul.f32 %v3176_v27, %v1720_v18  ;;  %v1721_v56 = vmul.f32 %v2655_v35, %v3044_v23  ;;  %v1630_v43 = vmax.f32 %v1551_v39, 0.0  ;;  %v2575_v45 = vpop.f32.mrb[66].mxu0 }
 0x47c   : > { %2268 = vst [vmem:[%s3199_s15 + $0x10] sm:$0xff] %v2200_v20   ;;  %v1756_v28 = vmul.f32 %v3176_v27, %v1718_v60  ;;  %v1719_v19 = vmul.f32 %v2657_v22, %v3047_v25  ;;  %v1664_v47 = vadd.f32 1e-05, %v1632_v11  ;;  %v1633_v38 = vmax.f32 %v2575_v45, 0.0  ;;  %v1554_v51 = vpop.f32.mrb[67].mxu0 }
 0x47d   : > { %v1759_v21 = vmul.f32 %v3176_v27, %v1721_v56  ;;  %v1662_v50 = vadd.f32 1e-05, %v1630_v43  ;;  %v1631_v30 = vmax.f32 %v1554_v51, 0.0  ;;  %v1796_v23 = vadd.f32 %v3185_v34, %v1758_v26 }
 0x47e   : > { %v1757_v4 = vmul.f32 %v3176_v27, %v1719_v19  ;;  %2666 = vrsqrt.f32 %v1664_v47  ;;  %v1665_v55 = vadd.f32 1e-05, %v1633_v38  ;;  %v1794_v25 = vadd.f32 %v3185_v34, %v1756_v28 }
 0x47f   : > { %v1797_v57 = vadd.f32 %v3185_v34, %v1759_v21  ;;  %2668 = vrsqrt.f32 %v1662_v50  ;;  %v1663_v29 = vadd.f32 1e-05, %v1631_v30 }
 0x480   : > { %v2659_v32 = vpop.eup %2658  ;;  %v1795_v1 = vadd.f32 %v3185_v34, %v1757_v4  ;;  %2670 = vrsqrt.f32 %v1665_v55 }
 0x481   : > { %v2661_v59 = vpop.eup %2660  ;;  %v2215_v10 = vpack.c.bf16 %v1797_v57, %v1796_v23  ;;  %v1724_v40 = vmul.f32 %v2659_v32, %v3058_v36  ;;  %2672 = vrsqrt.f32 %v1663_v29  ;;  %v2578_v63 = vpop.f32.mrb[68].mxu0 }
 0x482   : > { %v2663_v48 = vpop.eup %2662  ;;  %v2210_v12 = vpack.c.bf16 %v1795_v1, %v1794_v25  ;;  %v1722_v13 = vmul.f32 %v2661_v59, %v3061_v41  ;;  %v1636_v44 = vmax.f32 %v2578_v63, 0.0  ;;  %v1567_v33 = vpop.f32.mrb[69].mxu0 }
 0x483   : > { %v2665_v3 = vpop.eup %2664  ;;  %2271 = vst [vmem:[%s3199_s15 + $0x28] sm:$0xff] %v2215_v10   ;;  %v1762_v15 = vmul.f32 %v3176_v27, %v1724_v40  ;;  %v1725_v5 = vmul.f32 %v2663_v48, %v3064_v53  ;;  %v1634_v52 = vmax.f32 %v1567_v33, 0.0  ;;  %v2579_v17 = vpop.f32.mrb[70].mxu0 }
 0x484   : > { %2270 = vst [vmem:[%s3199_s15 + $0x20] sm:$0xff] %v2210_v12   ;;  %v1760_v18 = vmul.f32 %v3176_v27, %v1722_v13  ;;  %v1723_v36 = vmul.f32 %v2665_v3, %v3067_v0  ;;  %v1668_v7 = vadd.f32 1e-05, %v1636_v44  ;;  %v1637_v35 = vmax.f32 %v2579_v17, 0.0  ;;  %v1570_v20 = vpop.f32.mrb[71].mxu0 }
 0x485   : > { %v1763_v41 = vmul.f32 %v3176_v27, %v1725_v5  ;;  %v1666_v60 = vadd.f32 1e-05, %v1634_v52  ;;  %v1635_v11 = vmax.f32 %v1570_v20, 0.0  ;;  %v1800_v53 = vadd.f32 %v3185_v34, %v1762_v15 }
 0x486   : > { %v1761_v39 = vmul.f32 %v3176_v27, %v1723_v36  ;;  %2674 = vrsqrt.f32 %v1668_v7  ;;  %v1669_v22 = vadd.f32 1e-05, %v1637_v35  ;;  %v1798_v0 = vadd.f32 %v3185_v34, %v1760_v18 }
 0x487   : > { %v1801_v26 = vadd.f32 %v3185_v34, %v1763_v41  ;;  %2676 = vrsqrt.f32 %v1666_v60  ;;  %v1667_v56 = vadd.f32 1e-05, %v1635_v11 }
 0x488   : > { %v2667_v43 = vpop.eup %2666  ;;  %v1799_v45 = vadd.f32 %v3185_v34, %v1761_v39  ;;  %2678 = vrsqrt.f32 %v1669_v22 }
 0x489   : > { %v2669_v28 = vpop.eup %2668  ;;  %v2225_v19 = vpack.c.bf16 %v1801_v26, %v1800_v53  ;;  %v1728_v47 = vmul.f32 %v2667_v43, %v3078_v8  ;;  %2680 = vrsqrt.f32 %v1667_v56  ;;  %v2582_v38 = vpop.f32.mrb[72].mxu0 }
 0x48a   : > { %v2671_v51 = vpop.eup %2670  ;;  %v2220_v21 = vpack.c.bf16 %v1799_v45, %v1798_v0  ;;  %v1726_v50 = vmul.f32 %v2669_v28, %v3081_v37  ;;  %v1640_v30 = vmax.f32 %v2582_v38, 0.0  ;;  %v1583_v4 = vpop.f32.mrb[73].mxu0 }
 0x48b   : > { %v2673_v55 = vpop.eup %2672  ;;  %2273 = vst [vmem:[%s3199_s15 + $0x38] sm:$0xff] %v2225_v19   ;;  %v1766_v23 = vmul.f32 %v3176_v27, %v1728_v47  ;;  %v1729_v57 = vmul.f32 %v2671_v51, %v3084_v14  ;;  %v1638_v29 = vmax.f32 %v1583_v4, 0.0  ;;  %v2583_v32 = vpop.f32.mrb[74].mxu0 }
 0x48c   : > { %2272 = vst [vmem:[%s3199_s15 + $0x30] sm:$0xff] %v2220_v21   ;;  %v1764_v25 = vmul.f32 %v3176_v27, %v1726_v50  ;;  %v1727_v8 = vmul.f32 %v2673_v55, %v3087_v42  ;;  %v1672_v1 = vadd.f32 1e-05, %v1640_v30  ;;  %v1641_v59 = vmax.f32 %v2583_v32, 0.0  ;;  %v1586_v10 = vpop.f32.mrb[75].mxu0 }
 0x48d   : > { %v1767_v37 = vmul.f32 %v3176_v27, %v1729_v57  ;;  %v1670_v40 = vadd.f32 1e-05, %v1638_v29  ;;  %v1639_v63 = vmax.f32 %v1586_v10, 0.0  ;;  %v1804_v14 = vadd.f32 %v3185_v34, %v1766_v23 }
 0x48e   : > { %v1765_v48 = vmul.f32 %v3176_v27, %v1727_v8  ;;  %2682 = vrsqrt.f32 %v1672_v1  ;;  %v1673_v12 = vadd.f32 1e-05, %v1641_v59  ;;  %v1802_v42 = vadd.f32 %v3185_v34, %v1764_v25 }
 0x48f   : > { %v1805_v13 = vadd.f32 %v3185_v34, %v1767_v37  ;;  %2684 = vrsqrt.f32 %v1670_v40  ;;  %v1671_v44 = vadd.f32 1e-05, %v1639_v63 }
 0x490   : > { %v2675_v33 = vpop.eup %2674  ;;  %v1803_v3 = vadd.f32 %v3185_v34, %v1765_v48  ;;  %2686 = vrsqrt.f32 %v1673_v12 }
 0x491   : > { %v2677_v15 = vpop.eup %2676  ;;  %v2235_v5 = vpack.c.bf16 %v1805_v13, %v1804_v14  ;;  %v1732_v52 = vmul.f32 %v2675_v33, %v3098_v46  ;;  %2688 = vrsqrt.f32 %v1671_v44  ;;  %v2586_v17 = vpop.f32.mrb[76].mxu0 }
 0x492   : > { %v2679_v18 = vpop.eup %2678  ;;  %v2230_v36 = vpack.c.bf16 %v1803_v3, %v1802_v42  ;;  %v1730_v7 = vmul.f32 %v2677_v15, %v3101_v49  ;;  %v1644_v35 = vmax.f32 %v2586_v17, 0.0  ;;  %v1599_v20 = vpop.f32.mrb[77].mxu0 }
 0x493   : > { %v2681_v41 = vpop.eup %2680  ;;  %2275 = vst [vmem:[%s3199_s15 + $0x48] sm:$0xff] %v2235_v5   ;;  %v1770_v60 = vmul.f32 %v3176_v27, %v1732_v52  ;;  %v1733_v11 = vmul.f32 %v2679_v18, %v3104_v24  ;;  %v1642_v39 = vmax.f32 %v1599_v20, 0.0  ;;  %v2587_v22 = vpop.f32.mrb[78].mxu0 }
 0x494   : > { %2274 = vst [vmem:[%s3199_s15 + $0x40] sm:$0xff] %v2230_v36   ;;  %v1768_v53 = vmul.f32 %v3176_v27, %v1730_v7  ;;  %v1731_v46 = vmul.f32 %v2681_v41, %v3107_v54  ;;  %v1676_v26 = vadd.f32 1e-05, %v1644_v35  ;;  %v1645_v56 = vmax.f32 %v2587_v22, 0.0  ;;  %v1602_v43 = vpop.f32.mrb[79].mxu0 }
 0x495   : > { %v1771_v49 = vmul.f32 %v3176_v27, %v1733_v11  ;;  %v1674_v0 = vadd.f32 1e-05, %v1642_v39  ;;  %v1643_v45 = vmax.f32 %v1602_v43, 0.0  ;;  %v1808_v24 = vadd.f32 %v3185_v34, %v1770_v60 }
 0x496   : > { %v1769_v28 = vmul.f32 %v3176_v27, %v1731_v46  ;;  %2690 = vrsqrt.f32 %v1676_v26  ;;  %v1677_v19 = vadd.f32 1e-05, %v1645_v56  ;;  %v1806_v51 = vadd.f32 %v3185_v34, %v1768_v53 }
 0x497   : > { %v1809_v47 = vadd.f32 %v3185_v34, %v1771_v49  ;;  %2692 = vrsqrt.f32 %v1674_v0  ;;  %v1675_v38 = vadd.f32 1e-05, %v1643_v45 }
 0x498   : > { %v2683_v54 = vpop.eup %2682  ;;  %v1807_v21 = vadd.f32 %v3185_v34, %v1769_v28  ;;  %2694 = vrsqrt.f32 %v1677_v19 }
 0x499   : > { %v2685_v50 = vpop.eup %2684  ;;  %v2245_v30 = vpack.c.bf16 %v1809_v47, %v1808_v24  ;;  %v1736_v4 = vmul.f32 %v2683_v54, %v3118_v58  ;;  %2696 = vrsqrt.f32 %v1675_v38 }
 0x49a   : > { %v2687_v55 = vpop.eup %2686  ;;  %v2240_v23 = vpack.c.bf16 %v1807_v21, %v1806_v51  ;;  %v1734_v57 = vmul.f32 %v2685_v50, %v3121_v61 }
 0x49b   : > { %v2689_v29 = vpop.eup %2688  ;;  %2277 = vst [vmem:[%s3199_s15 + $0x58] sm:$0xff] %v2245_v30   ;;  %v1774_v32 = vmul.f32 %v3176_v27, %v1736_v4  ;;  %v1737_v25 = vmul.f32 %v2687_v55, %v3124_v62 }
 0x49c   : > { %2276 = vst [vmem:[%s3199_s15 + $0x50] sm:$0xff] %v2240_v23   ;;  %v1772_v8 = vmul.f32 %v3176_v27, %v1734_v57  ;;  %v1735_v1 = vmul.f32 %v2689_v29, %v3127_v2 }
 0x49d   : > { %v1775_v59 = vmul.f32 %v3176_v27, %v1737_v25  ;;  %v1812_v10 = vadd.f32 %v3185_v34, %v1774_v32 }
 0x49e   : > { %v1773_v58 = vmul.f32 %v3176_v27, %v1735_v1  ;;  %v1810_v40 = vadd.f32 %v3185_v34, %v1772_v8 }
 0x49f   : > { %v1813_v61 = vadd.f32 %v3185_v34, %v1775_v59 }
 0x4a0   : > { %v2691_v37 = vpop.eup %2690  ;;  %v1811_v62 = vadd.f32 %v3185_v34, %v1773_v58 }
 0x4a1   : > { %v2693_v63 = vpop.eup %2692  ;;  %v2255_v48 = vpack.c.bf16 %v1813_v61, %v1812_v10  ;;  %v1740_v12 = vmul.f32 %v2691_v37, %v3138_v6 }
 0x4a2   : > { %v2695_v14 = vpop.eup %2694  ;;  %v2250_v2 = vpack.c.bf16 %v1811_v62, %v1810_v40  ;;  %v1738_v13 = vmul.f32 %v2693_v63, %v3141_v9 }
 0x4a3   : > { %v2697_v44 = vpop.eup %2696  ;;  %2279 = vst [vmem:[%s3199_s15 + $0x68] sm:$0xff] %v2255_v48   ;;  %v1778_v33 = vmul.f32 %v3176_v27, %v1740_v12  ;;  %v1741_v42 = vmul.f32 %v2695_v14, %v3144_v16 }
 0x4a4   : > { %2278 = vst [vmem:[%s3199_s15 + $0x60] sm:$0xff] %v2250_v2   ;;  %v1776_v3 = vmul.f32 %v3176_v27, %v1738_v13  ;;  %v1739_v15 = vmul.f32 %v2697_v44, %v3147_v31 }
 0x4a5   : > { %v1779_v5 = vmul.f32 %v3176_v27, %v1741_v42  ;;  %v1816_v52 = vadd.f32 %v3185_v34, %v1778_v33 }
 0x4a6   : > { %v1777_v6 = vmul.f32 %v3176_v27, %v1739_v15  ;;  %v1814_v17 = vadd.f32 %v3185_v34, %v1776_v3 }
 0x4a7   : > { %v1817_v9 = vadd.f32 %v3185_v34, %v1779_v5 }
 0x4a8   : > { %v1815_v18 = vadd.f32 %v3185_v34, %v1777_v6 }
 0x4a9   : > { %v2265_v36 = vpack.c.bf16 %v1817_v9, %v1816_v52 }
 0x4aa   : > { %v2260_v7 = vpack.c.bf16 %v1815_v18, %v1814_v17 }
 0x4ab   : > { %2281 = vst [vmem:[%s3199_s15 + $0x78] sm:$0xff] %v2265_v36  }
 0x4ac   : > { %2280 = vst [vmem:[%s3199_s15 + $0x70] sm:$0xff] %v2260_v7  }
 0x4ad PF: > { %s16_s21 = sadd.s32 1, %s2704_s21  }
 0x4ae   : > { %p13_p4 = scmp.ge.s32.totalorder %s16_s21, 6  }
 0x4b0   :  { %15 = sbr.rel (!%p13_p4) target bundleno = 1 (0x1), region = 74 }

</bundles_post_ra>
